<compile_context>
chip_gen: v7x
topology: tpu7x:2x2x1
jax: 0.10.0
libtpu: 0.0.40
codegen_flags: <defaults>
</compile_context>

<pallas_src>
import math
import functools

import jax
import jax.numpy as jnp
from jax import lax
from jax.experimental import pallas as pl
from jax.experimental.pallas import tpu as pltpu

LN_EPS = 1e-5


def _gelu_exact(x):
    # PyTorch nn.GELU() default: exact erf formulation.
    return 0.5 * x * (1.0 + lax.erf(x / jnp.sqrt(2.0).astype(x.dtype)))


def _layer_norm(x, g, b):
    # Centered variance (matches PyTorch, avoids E[x^2]-mu^2 cancellation).
    mu = jnp.mean(x, axis=-1, keepdims=True)
    xc = x - mu
    var = jnp.mean(xc * xc, axis=-1, keepdims=True)
    return xc * lax.rsqrt(var + LN_EPS) * g + b


def _encoder_layer_kernel(xq_ref, xkv_ref,
                          wq_ref, wk_ref, wv_ref, bq_ref, bk_ref, bv_ref,
                          wo_ref, bo_ref, w1_ref, b1_ref, w2_ref, b2_ref,
                          g1_ref, be1_ref, g2_ref, be2_ref,
                          o_ref, k_scr, v_scr, *, nhead, n_ff, compute_dtype):
    f32 = jnp.float32
    cd = compute_dtype
    qi = pl.program_id(1)

    # ---- K/V projections: once per batch index, cached in VMEM scratch ----
    @pl.when(qi == 0)
    def _():
        xkv = xkv_ref[0]                                    # (S, D) already in compute dtype

        def kv_body(h, carry):
            k_scr[h] = (jnp.dot(xkv, wk_ref[h], preferred_element_type=f32)
                        + bk_ref[h]).astype(k_scr.dtype)
            v_scr[h] = (jnp.dot(xkv, wv_ref[h], preferred_element_type=f32)
                        + bv_ref[h]).astype(v_scr.dtype)
            return carry

        lax.fori_loop(0, nhead, kv_body, 0, unroll=True)

    xq = xq_ref[0]                                          # (TQ, D) f32, residual path
    xq_c = xq.astype(cd)

    # ---- self attention: per-head loop, out-projection fused into the accumulator ----
    def head_body(h, acc):
        # 1/sqrt(hd) is pre-folded into wq/bq on the host.
        q_h = jnp.dot(xq_c, wq_ref[h], preferred_element_type=f32) + bq_ref[h]   # (TQ, hd)
        k_h = k_scr[h]                                      # (S, hd) compute dtype (cached)
        v_h = v_scr[h]

        s = lax.dot_general(q_h.astype(cd), k_h,
                            (((1,), (1,)), ((), ())),
                            preferred_element_type=f32)     # (TQ, S) f32
        s = s - jnp.max(s, axis=-1, keepdims=True)
        p = jnp.exp(s)
        p = p * pl.reciprocal(jnp.sum(p, axis=-1, keepdims=True), approx=True)

        ctx = jnp.dot(p.astype(cd), v_h, preferred_element_type=f32)             # (TQ, hd)
        # concat(ctx_h) @ W_out == sum_h ctx_h @ W_out[h]
        return acc + jnp.dot(ctx.astype(cd), wo_ref[h], preferred_element_type=f32)

    acc0 = xq + bo_ref[...]                                 # residual + out-proj bias
    x_attn = lax.fori_loop(0, nhead, head_body, acc0, unroll=True)

    # ---- residual + LayerNorm 1 ----
    x1 = _layer_norm(x_attn, g1_ref[...], be1_ref[...])
    x1_c = x1.astype(cd)

    # ---- feed-forward, chunked over F: linear1 -> GELU -> linear2, accumulated ----
    def ffn_body(c, acc):
        h1c = jnp.dot(x1_c, w1_ref[c], preferred_element_type=f32) + b1_ref[c]   # (TQ, FC)
        h1c = _gelu_exact(h1c)
        return acc + jnp.dot(h1c.astype(cd), w2_ref[c], preferred_element_type=f32)

    ff0 = x1 + b2_ref[...]                                  # residual + linear2 bias
    y = lax.fori_loop(0, n_ff, ffn_body, ff0, unroll=True)

    # ---- residual + LayerNorm 2, one lane-dense store ----
    o_ref[0] = _layer_norm(y, g2_ref[...], be2_ref[...]).astype(o_ref.dtype)


def _largest_divisor_leq(n, cap):
    cap = min(cap, n)
    for c in range(cap, 0, -1):
        if n % c == 0:
            return c
    return n


def _choose_tq(S):
    if S <= 256:
        return S
    for t in (512, 256, 128, 64, 32, 16, 8):
        if S % t == 0:
            return t
    return S


def prepare_params(params, nhead, compute_dtype=jnp.float32, ff_chunk=512):
    """Hoisted, call-once weight preparation (head-split / F-chunk / cast / scale-fold)."""
    D = params["w_q"].shape[0]
    F = params["w1"].shape[1]
    assert D % nhead == 0
    H, hd = nhead, D // nhead
    cd = compute_dtype
    scale = 1.0 / math.sqrt(hd)
    FC = _largest_divisor_leq(F, ff_chunk)
    nF = F // FC

    def head_split(w):                                      # (D, D) -> (H, D, hd)
        return w.reshape(D, H, hd).transpose(1, 0, 2)

    prep = {
        "wq": head_split(params["w_q"] * scale).astype(cd),
        "wk": head_split(params["w_k"]).astype(cd),
        "wv": head_split(params["w_v"]).astype(cd),
        "bq": (params["b_q"] * scale).reshape(1, H, hd).transpose(1, 0, 2),      # (H, 1, hd) f32
        "bk": params["b_k"].reshape(1, H, hd).transpose(1, 0, 2),
        "bv": params["b_v"].reshape(1, H, hd).transpose(1, 0, 2),
        "wo": params["w_out"].reshape(H, hd, D).astype(cd),                      # (H, hd, D)
        "bo": params["b_out"],
        "w1": params["w1"].reshape(D, nF, FC).transpose(1, 0, 2).astype(cd),     # (nF, D, FC)
        "b1": params["b1"].reshape(1, nF, FC).transpose(1, 0, 2),                # (nF, 1, FC)
        "w2": params["w2"].reshape(nF, FC, D).astype(cd),                        # (nF, FC, D)
        "b2": params["b2"],
        "ln1_g": params["ln1_g"], "ln1_b": params["ln1_b"],
        "ln2_g": params["ln2_g"], "ln2_b": params["ln2_b"],
    }
    meta = dict(nhead=H, head_dim=hd, n_ff=nF, ff_chunk=FC,
                compute_dtype=cd, d_model=D, d_ff=F)
    return prep, meta


def encoder_layer_apply(x, prep, meta):
    """x: (B, S, D) float32. Grid over (batch [parallel], query tiles [arbitrary])."""
    B, S, D = x.shape
    H, hd = meta["nhead"], meta["head_dim"]
    nF, FC = meta["n_ff"], meta["ff_chunk"]
    cd = meta["compute_dtype"]
    csz = jnp.dtype(cd).itemsize

    def vmem_estimate(tq):
        pad = lambda n: -(-n // 128) * 128
        wbytes = csz * (3 * H * D * pad(hd) + H * hd * pad(D)
                        + nF * D * pad(FC) + nF * FC * pad(D))        # one copy of weights
        kvscr = 2 * csz * H * S * pad(hd)                             # K/V scratch
        io = 2 * (2 * 4 * tq * D) + 2 * csz * S * D                   # dbl-buffered xq/out + xkv
        tmp = 4 * (tq * S + tq * pad(FC) + 6 * tq * D)                # f32 temporaries
        return int(1.3 * (2 * wbytes + kvscr + io + tmp))

    VMEM_CAP = 48 * 1024 * 1024   # headroom on v7x (64 MiB physical); fine on v5e/v6e too
    TQ = _choose_tq(S)
    while vmem_estimate(TQ) > VMEM_CAP and TQ > 8 and TQ % 2 == 0:
        TQ //= 2
    n_q = S // TQ
    vmem_limit = int(min(VMEM_CAP, max(vmem_estimate(TQ), 32 * 1024 * 1024)))

    # Pre-cast the KV stream once in the wrapper (halves DMA bytes / VMEM on the bf16 path).
    x_kv = x.astype(cd)

    full = lambda shp: pl.BlockSpec(shp, lambda b, qi: (0,) * len(shp))
    in_specs = [
        pl.BlockSpec((1, TQ, D), lambda b, qi: (b, qi, 0)),   # query rows (f32, residual path)
        pl.BlockSpec((1, S, D), lambda b, qi: (b, 0, 0)),     # full sequence (KV source, cd)
        full((H, D, hd)), full((H, D, hd)), full((H, D, hd)),  # w_q, w_k, w_v (head-split)
        full((H, 1, hd)), full((H, 1, hd)), full((H, 1, hd)),  # b_q, b_k, b_v
        full((H, hd, D)), full((1, D)),                        # w_out (head-split), b_out
        full((nF, D, FC)), full((nF, 1, FC)),                  # w1, b1 (F-chunked)
        full((nF, FC, D)), full((1, D)),                       # w2 (F-chunked), b2
        full((1, D)), full((1, D)), full((1, D)), full((1, D)),  # ln1_g, ln1_b, ln2_g, ln2_b
    ]

    kernel = functools.partial(_encoder_layer_kernel, nhead=H, n_ff=nF, compute_dtype=cd)
    return pl.pallas_call(
        kernel,
        out_shape=jax.ShapeDtypeStruct((B, S, D), x.dtype),
        grid_spec=pltpu.PrefetchScalarGridSpec(
            num_scalar_prefetch=0,
            grid=(B, n_q),
            in_specs=in_specs,
            out_specs=pl.BlockSpec((1, TQ, D), lambda b, qi: (b, qi, 0)),
            scratch_shapes=[pltpu.VMEM((H, S, hd), cd),     # cached K (per head)
                            pltpu.VMEM((H, S, hd), cd)],    # cached V (per head)
        ),
        compiler_params=pltpu.CompilerParams(
            dimension_semantics=("parallel", "arbitrary"),
            vmem_limit_bytes=vmem_limit),
    )(x, x_kv,
      prep["wq"], prep["wk"], prep["wv"], prep["bq"], prep["bk"], prep["bv"],
      prep["wo"], prep["bo"], prep["w1"], prep["b1"], prep["w2"], prep["b2"],
      prep["ln1_g"], prep["ln1_b"], prep["ln2_g"], prep["ln2_b"])


def transformer_encoder_layer(x, params, nhead, compute_dtype=jnp.float32):
    prep, meta = prepare_params(params, nhead, compute_dtype)
    return encoder_layer_apply(x, prep, meta)


def reference_forward(x, params, nhead):
    """Pure-JAX mirror of PyTorch TransformerEncoderLayer.forward (eval mode)."""
    B, S, D = x.shape
    hd = D // nhead
    q = x @ params["w_q"] + params["b_q"]
    k = x @ params["w_k"] + params["b_k"]
    v = x @ params["w_v"] + params["b_v"]

    def split_heads(t):  # (B, S, D) -> (B, H, S, hd)
        return t.reshape(B, S, nhead, hd).transpose(0, 2, 1, 3)

    qh, kh, vh = split_heads(q), split_heads(k), split_heads(v)
    scores = jnp.einsum("bhqd,bhkd->bhqk", qh, kh) / math.sqrt(hd)
    probs = jax.nn.softmax(scores, axis=-1)
    ctx = jnp.einsum("bhqk,bhkd->bhqd", probs, vh)
    ctx = ctx.transpose(0, 2, 1, 3).reshape(B, S, D)
    attn = ctx @ params["w_out"] + params["b_out"]

    def layer_norm(t, g, b):
        mu = jnp.mean(t, -1, keepdims=True)
        var = jnp.mean((t - mu) ** 2, -1, keepdims=True)
        return (t - mu) * lax.rsqrt(var + LN_EPS) * g + b

    x1 = layer_norm(x + attn, params["ln1_g"], params["ln1_b"])
    h1 = _gelu_exact(x1 @ params["w1"] + params["b1"])
    ff = h1 @ params["w2"] + params["b2"]
    return layer_norm(x1 + ff, params["ln2_g"], params["ln2_b"])


def make_params(key, d_model, nhead, dim_feedforward):
    ks = jax.random.split(key, 12)
    s = 0.05
    f32 = jnp.float32
    return {
        # Stored pre-transposed: y = x @ W + b
        "w_q": jax.random.normal(ks[0], (d_model, d_model), f32) * s,
        "w_k": jax.random.normal(ks[1], (d_model, d_model), f32) * s,
        "w_v": jax.random.normal(ks[2], (d_model, d_model), f32) * s,
        "b_q": jax.random.normal(ks[3], (1, d_model), f32) * s,
        "b_k": jax.random.normal(ks[4], (1, d_model), f32) * s,
        "b_v": jax.random.normal(ks[5], (1, d_model), f32) * s,
        "w_out": jax.random.normal(ks[6], (d_model, d_model), f32) * s,
        "b_out": jax.random.normal(ks[7], (1, d_model), f32) * s,
        "w1": jax.random.normal(ks[8], (d_model, dim_feedforward), f32) * s,
        "b1": jax.random.normal(ks[9], (1, dim_feedforward), f32) * s,
        "w2": jax.random.normal(ks[10], (dim_feedforward, d_model), f32) * s,
        "b2": jax.random.normal(ks[11], (1, d_model), f32) * s,
        "ln1_g": jnp.ones((1, d_model), f32),
        "ln1_b": jnp.zeros((1, d_model), f32),
        "ln2_g": jnp.ones((1, d_model), f32),
        "ln2_b": jnp.zeros((1, d_model), f32),
    }


if __name__ == "__main__":
    B, S, d_model, nhead, dim_ff = 2, 8, 32, 4, 64
    key = jax.random.PRNGKey(0)
    kx, kp = jax.random.split(key)
    x = jax.random.normal(kx, (B, S, d_model), jnp.float32)
    params = make_params(kp, d_model, nhead, dim_ff)

    ref = reference_forward(x, params, nhead)

    # f32 MXU path (weight prep hoisted out of the call):
    prep_f32, meta_f32 = prepare_params(params, nhead, jnp.float32)
    out = jax.block_until_ready(encoder_layer_apply(x, prep_f32, meta_f32))
    assert out.shape == (B, S, d_model)
    err = float(jnp.max(jnp.abs(out - ref)))
    assert err < 5e-3, f"f32 path max err {err}"

    # bf16 MXU inputs / f32 accumulation: the throughput path on v6e/v7x.
    prep_bf16, meta_bf16 = prepare_params(params, nhead, jnp.bfloat16)
    out_bf16 = jax.block_until_ready(encoder_layer_apply(x, prep_bf16, meta_bf16))
    assert bool(jnp.isfinite(out_bf16).all())
    err_bf16 = float(jnp.max(jnp.abs(out_bf16 - ref)))
    assert err_bf16 < 1e-1, f"bf16 path max err {err_bf16}"

    print("KERNEL_OK")
</pallas_src>

<mosaic_0001>
module attributes {stable_mosaic.version = 11 : i64} {
  func.func @_encoder_layer_kernel(%arg0: i32, %arg1: i32, %arg2: memref<1x8x32xf32, #tpu.memory_space<vmem>>, %arg3: memref<1x8x32xf32, #tpu.memory_space<vmem>>, %arg4: memref<4x32x8xf32, #tpu.memory_space<vmem>>, %arg5: memref<4x32x8xf32, #tpu.memory_space<vmem>>, %arg6: memref<4x32x8xf32, #tpu.memory_space<vmem>>, %arg7: memref<4x1x8xf32, #tpu.memory_space<vmem>>, %arg8: memref<4x1x8xf32, #tpu.memory_space<vmem>>, %arg9: memref<4x1x8xf32, #tpu.memory_space<vmem>>, %arg10: memref<4x8x32xf32, #tpu.memory_space<vmem>>, %arg11: memref<1x32xf32, #tpu.memory_space<vmem>>, %arg12: memref<1x32x64xf32, #tpu.memory_space<vmem>>, %arg13: memref<1x1x64xf32, #tpu.memory_space<vmem>>, %arg14: memref<1x64x32xf32, #tpu.memory_space<vmem>>, %arg15: memref<1x32xf32, #tpu.memory_space<vmem>>, %arg16: memref<1x32xf32, #tpu.memory_space<vmem>>, %arg17: memref<1x32xf32, #tpu.memory_space<vmem>>, %arg18: memref<1x32xf32, #tpu.memory_space<vmem>>, %arg19: memref<1x32xf32, #tpu.memory_space<vmem>>, %arg20: memref<1x8x32xf32, #tpu.memory_space<vmem>>, %arg21: memref<4x8x8xf32, #tpu.memory_space<vmem>>, %arg22: memref<4x8x8xf32, #tpu.memory_space<vmem>>) attributes {dimension_semantics = [#tpu.dimension_semantics<parallel>, #tpu.dimension_semantics<arbitrary>], iteration_bounds = array<i64: 2, 1>, scalar_prefetch = 0 : i64, scratch_operands = 2 : i64, tpu.core_type = #tpu.core_type<tc>, window_params = [{transform_indices = @transform_0, window_bounds = array<i64: 1, 8, 32>}, {transform_indices = @transform_1, window_bounds = array<i64: 1, 8, 32>}, {pipeline_mode = #tpu.pipeline_mode<synchronous>, transform_indices = @transform_2, window_bounds = array<i64: 4, 32, 8>}, {pipeline_mode = #tpu.pipeline_mode<synchronous>, transform_indices = @transform_3, window_bounds = array<i64: 4, 32, 8>}, {pipeline_mode = #tpu.pipeline_mode<synchronous>, transform_indices = @transform_4, window_bounds = array<i64: 4, 32, 8>}, {pipeline_mode = #tpu.pipeline_mode<synchronous>, transform_indices = @transform_5, window_bounds = array<i64: 4, 1, 8>}, {pipeline_mode = #tpu.pipeline_mode<synchronous>, transform_indices = @transform_6, window_bounds = array<i64: 4, 1, 8>}, {pipeline_mode = #tpu.pipeline_mode<synchronous>, transform_indices = @transform_7, window_bounds = array<i64: 4, 1, 8>}, {pipeline_mode = #tpu.pipeline_mode<synchronous>, transform_indices = @transform_8, window_bounds = array<i64: 4, 8, 32>}, {pipeline_mode = #tpu.pipeline_mode<synchronous>, transform_indices = @transform_9, window_bounds = array<i64: 1, 32>}, {pipeline_mode = #tpu.pipeline_mode<synchronous>, transform_indices = @transform_10, window_bounds = array<i64: 1, 32, 64>}, {pipeline_mode = #tpu.pipeline_mode<synchronous>, transform_indices = @transform_11, window_bounds = array<i64: 1, 1, 64>}, {pipeline_mode = #tpu.pipeline_mode<synchronous>, transform_indices = @transform_12, window_bounds = array<i64: 1, 64, 32>}, {pipeline_mode = #tpu.pipeline_mode<synchronous>, transform_indices = @transform_13, window_bounds = array<i64: 1, 32>}, {pipeline_mode = #tpu.pipeline_mode<synchronous>, transform_indices = @transform_14, window_bounds = array<i64: 1, 32>}, {pipeline_mode = #tpu.pipeline_mode<synchronous>, transform_indices = @transform_15, window_bounds = array<i64: 1, 32>}, {pipeline_mode = #tpu.pipeline_mode<synchronous>, transform_indices = @transform_16, window_bounds = array<i64: 1, 32>}, {pipeline_mode = #tpu.pipeline_mode<synchronous>, transform_indices = @transform_17, window_bounds = array<i64: 1, 32>}, {transform_indices = @transform_18, window_bounds = array<i64: 1, 8, 32>}]} {
    %c0_i32 = arith.constant 0 : i32
    %0 = arith.cmpi eq, %arg1, %c0_i32 : i32
    %1 = arith.extui %0 : i1 to i32
    %c0_i32_0 = arith.constant 0 : i32
    %2 = arith.cmpi ne, %1, %c0_i32_0 : i32
    scf.if %2 {
      %c0_105 = arith.constant 0 : index
      %c0_106 = arith.constant 0 : index
      %c0_107 = arith.constant 0 : index
      %209 = vector.load %arg3[%c0_105, %c0_106, %c0_107] : memref<1x8x32xf32, #tpu.memory_space<vmem>>, vector<1x8x32xf32>
      %210 = vector.shape_cast %209 : vector<1x8x32xf32> to vector<8x32xf32>
      %c0_i32_108 = arith.constant 0 : i32
      %211 = arith.index_cast %c0_i32_108 : i32 to index
      %c0_109 = arith.constant 0 : index
      %c0_110 = arith.constant 0 : index
      %212 = vector.load %arg5[%211, %c0_109, %c0_110] : memref<4x32x8xf32, #tpu.memory_space<vmem>>, vector<1x32x8xf32>
      %213 = vector.shape_cast %212 : vector<1x32x8xf32> to vector<32x8xf32>
      %cst_111 = arith.constant dense<0.000000e+00> : vector<8x8xf32>
      %214 = tpu.matmul %210, %213, %cst_111 {dimension_numbers = #tpu.dot_dimension_numbers<[1], [0], [0], [1], [0, 0, 1, 1], [], []>} : vector<8x32xf32>, vector<32x8xf32>, vector<8x8xf32> -> vector<8x8xf32>
      %215 = arith.index_cast %c0_i32_108 : i32 to index
      %c0_112 = arith.constant 0 : index
      %c0_113 = arith.constant 0 : index
      %216 = vector.load %arg8[%215, %c0_112, %c0_113] : memref<4x1x8xf32, #tpu.memory_space<vmem>>, vector<1x1x8xf32>
      %217 = vector.shape_cast %216 : vector<1x1x8xf32> to vector<1x8xf32>
      %218 = vector.broadcast %217 : vector<1x8xf32> to vector<8x8xf32>
      %219 = arith.addf %214, %218 : vector<8x8xf32>
      %220 = arith.index_cast %c0_i32_108 : i32 to index
      %c0_114 = arith.constant 0 : index
      %c0_115 = arith.constant 0 : index
      %221 = vector.load %arg21[%220, %c0_114, %c0_115] : memref<4x8x8xf32, #tpu.memory_space<vmem>>, vector<1x8x8xf32>
      %222 = vector.shape_cast %221 : vector<1x8x8xf32> to vector<8x8xf32>
      %223 = vector.shape_cast %219 : vector<8x8xf32> to vector<1x8x8xf32>
      tpu.vector_store %arg21[%220, %c0_114, %c0_115], %223 {strides = array<i32>} : memref<4x8x8xf32, #tpu.memory_space<vmem>>, vector<1x8x8xf32>,
      %224 = arith.index_cast %c0_i32_108 : i32 to index
      %c0_116 = arith.constant 0 : index
      %c0_117 = arith.constant 0 : index
      %225 = vector.load %arg6[%224, %c0_116, %c0_117] : memref<4x32x8xf32, #tpu.memory_space<vmem>>, vector<1x32x8xf32>
      %226 = vector.shape_cast %225 : vector<1x32x8xf32> to vector<32x8xf32>
      %cst_118 = arith.constant dense<0.000000e+00> : vector<8x8xf32>
      %227 = tpu.matmul %210, %226, %cst_118 {dimension_numbers = #tpu.dot_dimension_numbers<[1], [0], [0], [1], [0, 0, 1, 1], [], []>} : vector<8x32xf32>, vector<32x8xf32>, vector<8x8xf32> -> vector<8x8xf32>
      %228 = arith.index_cast %c0_i32_108 : i32 to index
      %c0_119 = arith.constant 0 : index
      %c0_120 = arith.constant 0 : index
      %229 = vector.load %arg9[%228, %c0_119, %c0_120] : memref<4x1x8xf32, #tpu.memory_space<vmem>>, vector<1x1x8xf32>
      %230 = vector.shape_cast %229 : vector<1x1x8xf32> to vector<1x8xf32>
      %231 = vector.broadcast %230 : vector<1x8xf32> to vector<8x8xf32>
      %232 = arith.addf %227, %231 : vector<8x8xf32>
      %233 = arith.index_cast %c0_i32_108 : i32 to index
      %c0_121 = arith.constant 0 : index
      %c0_122 = arith.constant 0 : index
      %234 = vector.load %arg22[%233, %c0_121, %c0_122] : memref<4x8x8xf32, #tpu.memory_space<vmem>>, vector<1x8x8xf32>
      %235 = vector.shape_cast %234 : vector<1x8x8xf32> to vector<8x8xf32>
      %236 = vector.shape_cast %232 : vector<8x8xf32> to vector<1x8x8xf32>
      tpu.vector_store %arg22[%233, %c0_121, %c0_122], %236 {strides = array<i32>} : memref<4x8x8xf32, #tpu.memory_space<vmem>>, vector<1x8x8xf32>,
      %c1_i32_123 = arith.constant 1 : i32
      %237 = arith.index_cast %c1_i32_123 : i32 to index
      %c0_124 = arith.constant 0 : index
      %c0_125 = arith.constant 0 : index
      %238 = vector.load %arg5[%237, %c0_124, %c0_125] : memref<4x32x8xf32, #tpu.memory_space<vmem>>, vector<1x32x8xf32>
      %239 = vector.shape_cast %238 : vector<1x32x8xf32> to vector<32x8xf32>
      %cst_126 = arith.constant dense<0.000000e+00> : vector<8x8xf32>
      %240 = tpu.matmul %210, %239, %cst_126 {dimension_numbers = #tpu.dot_dimension_numbers<[1], [0], [0], [1], [0, 0, 1, 1], [], []>} : vector<8x32xf32>, vector<32x8xf32>, vector<8x8xf32> -> vector<8x8xf32>
      %241 = arith.index_cast %c1_i32_123 : i32 to index
      %c0_127 = arith.constant 0 : index
      %c0_128 = arith.constant 0 : index
      %242 = vector.load %arg8[%241, %c0_127, %c0_128] : memref<4x1x8xf32, #tpu.memory_space<vmem>>, vector<1x1x8xf32>
      %243 = vector.shape_cast %242 : vector<1x1x8xf32> to vector<1x8xf32>
      %244 = vector.broadcast %243 : vector<1x8xf32> to vector<8x8xf32>
      %245 = arith.addf %240, %244 : vector<8x8xf32>
      %246 = arith.index_cast %c1_i32_123 : i32 to index
      %c0_129 = arith.constant 0 : index
      %c0_130 = arith.constant 0 : index
      %247 = vector.load %arg21[%246, %c0_129, %c0_130] : memref<4x8x8xf32, #tpu.memory_space<vmem>>, vector<1x8x8xf32>
      %248 = vector.shape_cast %247 : vector<1x8x8xf32> to vector<8x8xf32>
      %249 = vector.shape_cast %245 : vector<8x8xf32> to vector<1x8x8xf32>
      tpu.vector_store %arg21[%246, %c0_129, %c0_130], %249 {strides = array<i32>} : memref<4x8x8xf32, #tpu.memory_space<vmem>>, vector<1x8x8xf32>,
      %250 = arith.index_cast %c1_i32_123 : i32 to index
      %c0_131 = arith.constant 0 : index
      %c0_132 = arith.constant 0 : index
      %251 = vector.load %arg6[%250, %c0_131, %c0_132] : memref<4x32x8xf32, #tpu.memory_space<vmem>>, vector<1x32x8xf32>
      %252 = vector.shape_cast %251 : vector<1x32x8xf32> to vector<32x8xf32>
      %cst_133 = arith.constant dense<0.000000e+00> : vector<8x8xf32>
      %253 = tpu.matmul %210, %252, %cst_133 {dimension_numbers = #tpu.dot_dimension_numbers<[1], [0], [0], [1], [0, 0, 1, 1], [], []>} : vector<8x32xf32>, vector<32x8xf32>, vector<8x8xf32> -> vector<8x8xf32>
      %254 = arith.index_cast %c1_i32_123 : i32 to index
      %c0_134 = arith.constant 0 : index
      %c0_135 = arith.constant 0 : index
      %255 = vector.load %arg9[%254, %c0_134, %c0_135] : memref<4x1x8xf32, #tpu.memory_space<vmem>>, vector<1x1x8xf32>
      %256 = vector.shape_cast %255 : vector<1x1x8xf32> to vector<1x8xf32>
      %257 = vector.broadcast %256 : vector<1x8xf32> to vector<8x8xf32>
      %258 = arith.addf %253, %257 : vector<8x8xf32>
      %259 = arith.index_cast %c1_i32_123 : i32 to index
      %c0_136 = arith.constant 0 : index
      %c0_137 = arith.constant 0 : index
      %260 = vector.load %arg22[%259, %c0_136, %c0_137] : memref<4x8x8xf32, #tpu.memory_space<vmem>>, vector<1x8x8xf32>
      %261 = vector.shape_cast %260 : vector<1x8x8xf32> to vector<8x8xf32>
      %262 = vector.shape_cast %258 : vector<8x8xf32> to vector<1x8x8xf32>
      tpu.vector_store %arg22[%259, %c0_136, %c0_137], %262 {strides = array<i32>} : memref<4x8x8xf32, #tpu.memory_space<vmem>>, vector<1x8x8xf32>,
      %c2_i32_138 = arith.constant 2 : i32
      %263 = arith.index_cast %c2_i32_138 : i32 to index
      %c0_139 = arith.constant 0 : index
      %c0_140 = arith.constant 0 : index
      %264 = vector.load %arg5[%263, %c0_139, %c0_140] : memref<4x32x8xf32, #tpu.memory_space<vmem>>, vector<1x32x8xf32>
      %265 = vector.shape_cast %264 : vector<1x32x8xf32> to vector<32x8xf32>
      %cst_141 = arith.constant dense<0.000000e+00> : vector<8x8xf32>
      %266 = tpu.matmul %210, %265, %cst_141 {dimension_numbers = #tpu.dot_dimension_numbers<[1], [0], [0], [1], [0, 0, 1, 1], [], []>} : vector<8x32xf32>, vector<32x8xf32>, vector<8x8xf32> -> vector<8x8xf32>
      %267 = arith.index_cast %c2_i32_138 : i32 to index
      %c0_142 = arith.constant 0 : index
      %c0_143 = arith.constant 0 : index
      %268 = vector.load %arg8[%267, %c0_142, %c0_143] : memref<4x1x8xf32, #tpu.memory_space<vmem>>, vector<1x1x8xf32>
      %269 = vector.shape_cast %268 : vector<1x1x8xf32> to vector<1x8xf32>
      %270 = vector.broadcast %269 : vector<1x8xf32> to vector<8x8xf32>
      %271 = arith.addf %266, %270 : vector<8x8xf32>
      %272 = arith.index_cast %c2_i32_138 : i32 to index
      %c0_144 = arith.constant 0 : index
      %c0_145 = arith.constant 0 : index
      %273 = vector.load %arg21[%272, %c0_144, %c0_145] : memref<4x8x8xf32, #tpu.memory_space<vmem>>, vector<1x8x8xf32>
      %274 = vector.shape_cast %273 : vector<1x8x8xf32> to vector<8x8xf32>
      %275 = vector.shape_cast %271 : vector<8x8xf32> to vector<1x8x8xf32>
      tpu.vector_store %arg21[%272, %c0_144, %c0_145], %275 {strides = array<i32>} : memref<4x8x8xf32, #tpu.memory_space<vmem>>, vector<1x8x8xf32>,
      %276 = arith.index_cast %c2_i32_138 : i32 to index
      %c0_146 = arith.constant 0 : index
      %c0_147 = arith.constant 0 : index
      %277 = vector.load %arg6[%276, %c0_146, %c0_147] : memref<4x32x8xf32, #tpu.memory_space<vmem>>, vector<1x32x8xf32>
      %278 = vector.shape_cast %277 : vector<1x32x8xf32> to vector<32x8xf32>
      %cst_148 = arith.constant dense<0.000000e+00> : vector<8x8xf32>
      %279 = tpu.matmul %210, %278, %cst_148 {dimension_numbers = #tpu.dot_dimension_numbers<[1], [0], [0], [1], [0, 0, 1, 1], [], []>} : vector<8x32xf32>, vector<32x8xf32>, vector<8x8xf32> -> vector<8x8xf32>
      %280 = arith.index_cast %c2_i32_138 : i32 to index
      %c0_149 = arith.constant 0 : index
      %c0_150 = arith.constant 0 : index
      %281 = vector.load %arg9[%280, %c0_149, %c0_150] : memref<4x1x8xf32, #tpu.memory_space<vmem>>, vector<1x1x8xf32>
      %282 = vector.shape_cast %281 : vector<1x1x8xf32> to vector<1x8xf32>
      %283 = vector.broadcast %282 : vector<1x8xf32> to vector<8x8xf32>
      %284 = arith.addf %279, %283 : vector<8x8xf32>
      %285 = arith.index_cast %c2_i32_138 : i32 to index
      %c0_151 = arith.constant 0 : index
      %c0_152 = arith.constant 0 : index
      %286 = vector.load %arg22[%285, %c0_151, %c0_152] : memref<4x8x8xf32, #tpu.memory_space<vmem>>, vector<1x8x8xf32>
      %287 = vector.shape_cast %286 : vector<1x8x8xf32> to vector<8x8xf32>
      %288 = vector.shape_cast %284 : vector<8x8xf32> to vector<1x8x8xf32>
      tpu.vector_store %arg22[%285, %c0_151, %c0_152], %288 {strides = array<i32>} : memref<4x8x8xf32, #tpu.memory_space<vmem>>, vector<1x8x8xf32>,
      %c3_i32_153 = arith.constant 3 : i32
      %289 = arith.index_cast %c3_i32_153 : i32 to index
      %c0_154 = arith.constant 0 : index
      %c0_155 = arith.constant 0 : index
      %290 = vector.load %arg5[%289, %c0_154, %c0_155] : memref<4x32x8xf32, #tpu.memory_space<vmem>>, vector<1x32x8xf32>
      %291 = vector.shape_cast %290 : vector<1x32x8xf32> to vector<32x8xf32>
      %cst_156 = arith.constant dense<0.000000e+00> : vector<8x8xf32>
      %292 = tpu.matmul %210, %291, %cst_156 {dimension_numbers = #tpu.dot_dimension_numbers<[1], [0], [0], [1], [0, 0, 1, 1], [], []>} : vector<8x32xf32>, vector<32x8xf32>, vector<8x8xf32> -> vector<8x8xf32>
      %293 = arith.index_cast %c3_i32_153 : i32 to index
      %c0_157 = arith.constant 0 : index
      %c0_158 = arith.constant 0 : index
      %294 = vector.load %arg8[%293, %c0_157, %c0_158] : memref<4x1x8xf32, #tpu.memory_space<vmem>>, vector<1x1x8xf32>
      %295 = vector.shape_cast %294 : vector<1x1x8xf32> to vector<1x8xf32>
      %296 = vector.broadcast %295 : vector<1x8xf32> to vector<8x8xf32>
      %297 = arith.addf %292, %296 : vector<8x8xf32>
      %298 = arith.index_cast %c3_i32_153 : i32 to index
      %c0_159 = arith.constant 0 : index
      %c0_160 = arith.constant 0 : index
      %299 = vector.load %arg21[%298, %c0_159, %c0_160] : memref<4x8x8xf32, #tpu.memory_space<vmem>>, vector<1x8x8xf32>
      %300 = vector.shape_cast %299 : vector<1x8x8xf32> to vector<8x8xf32>
      %301 = vector.shape_cast %297 : vector<8x8xf32> to vector<1x8x8xf32>
      tpu.vector_store %arg21[%298, %c0_159, %c0_160], %301 {strides = array<i32>} : memref<4x8x8xf32, #tpu.memory_space<vmem>>, vector<1x8x8xf32>,
      %302 = arith.index_cast %c3_i32_153 : i32 to index
      %c0_161 = arith.constant 0 : index
      %c0_162 = arith.constant 0 : index
      %303 = vector.load %arg6[%302, %c0_161, %c0_162] : memref<4x32x8xf32, #tpu.memory_space<vmem>>, vector<1x32x8xf32>
      %304 = vector.shape_cast %303 : vector<1x32x8xf32> to vector<32x8xf32>
      %cst_163 = arith.constant dense<0.000000e+00> : vector<8x8xf32>
      %305 = tpu.matmul %210, %304, %cst_163 {dimension_numbers = #tpu.dot_dimension_numbers<[1], [0], [0], [1], [0, 0, 1, 1], [], []>} : vector<8x32xf32>, vector<32x8xf32>, vector<8x8xf32> -> vector<8x8xf32>
      %306 = arith.index_cast %c3_i32_153 : i32 to index
      %c0_164 = arith.constant 0 : index
      %c0_165 = arith.constant 0 : index
      %307 = vector.load %arg9[%306, %c0_164, %c0_165] : memref<4x1x8xf32, #tpu.memory_space<vmem>>, vector<1x1x8xf32>
      %308 = vector.shape_cast %307 : vector<1x1x8xf32> to vector<1x8xf32>
      %309 = vector.broadcast %308 : vector<1x8xf32> to vector<8x8xf32>
      %310 = arith.addf %305, %309 : vector<8x8xf32>
      %311 = arith.index_cast %c3_i32_153 : i32 to index
      %c0_166 = arith.constant 0 : index
      %c0_167 = arith.constant 0 : index
      %312 = vector.load %arg22[%311, %c0_166, %c0_167] : memref<4x8x8xf32, #tpu.memory_space<vmem>>, vector<1x8x8xf32>
      %313 = vector.shape_cast %312 : vector<1x8x8xf32> to vector<8x8xf32>
      %314 = vector.shape_cast %310 : vector<8x8xf32> to vector<1x8x8xf32>
      tpu.vector_store %arg22[%311, %c0_166, %c0_167], %314 {strides = array<i32>} : memref<4x8x8xf32, #tpu.memory_space<vmem>>, vector<1x8x8xf32>,
      %c4_i32_168 = arith.constant 4 : i32
    } else {
    }
    %c0 = arith.constant 0 : index
    %c0_1 = arith.constant 0 : index
    %c0_2 = arith.constant 0 : index
    %3 = vector.load %arg2[%c0, %c0_1, %c0_2] : memref<1x8x32xf32, #tpu.memory_space<vmem>>, vector<1x8x32xf32>
    %4 = vector.shape_cast %3 : vector<1x8x32xf32> to vector<8x32xf32>
    %c0_3 = arith.constant 0 : index
    %c0_4 = arith.constant 0 : index
    %5 = vector.load %arg11[%c0_3, %c0_4] : memref<1x32xf32, #tpu.memory_space<vmem>>, vector<1x32xf32>
    %6 = vector.broadcast %5 : vector<1x32xf32> to vector<8x32xf32>
    %7 = arith.addf %4, %6 : vector<8x32xf32>
    %c0_i32_5 = arith.constant 0 : i32
    %8 = arith.index_cast %c0_i32_5 : i32 to index
    %c0_6 = arith.constant 0 : index
    %c0_7 = arith.constant 0 : index
    %9 = vector.load %arg4[%8, %c0_6, %c0_7] : memref<4x32x8xf32, #tpu.memory_space<vmem>>, vector<1x32x8xf32>
    %10 = vector.shape_cast %9 : vector<1x32x8xf32> to vector<32x8xf32>
    %cst = arith.constant dense<0.000000e+00> : vector<8x8xf32>
    %11 = tpu.matmul %4, %10, %cst {dimension_numbers = #tpu.dot_dimension_numbers<[1], [0], [0], [1], [0, 0, 1, 1], [], []>} : vector<8x32xf32>, vector<32x8xf32>, vector<8x8xf32> -> vector<8x8xf32>
    %12 = arith.index_cast %c0_i32_5 : i32 to index
    %c0_8 = arith.constant 0 : index
    %c0_9 = arith.constant 0 : index
    %13 = vector.load %arg7[%12, %c0_8, %c0_9] : memref<4x1x8xf32, #tpu.memory_space<vmem>>, vector<1x1x8xf32>
    %14 = vector.shape_cast %13 : vector<1x1x8xf32> to vector<1x8xf32>
    %15 = vector.broadcast %14 : vector<1x8xf32> to vector<8x8xf32>
    %16 = arith.addf %11, %15 : vector<8x8xf32>
    %17 = arith.index_cast %c0_i32_5 : i32 to index
    %c0_10 = arith.constant 0 : index
    %c0_11 = arith.constant 0 : index
    %18 = vector.load %arg21[%17, %c0_10, %c0_11] : memref<4x8x8xf32, #tpu.memory_space<vmem>>, vector<1x8x8xf32>
    %19 = vector.shape_cast %18 : vector<1x8x8xf32> to vector<8x8xf32>
    %20 = arith.index_cast %c0_i32_5 : i32 to index
    %c0_12 = arith.constant 0 : index
    %c0_13 = arith.constant 0 : index
    %21 = vector.load %arg22[%20, %c0_12, %c0_13] : memref<4x8x8xf32, #tpu.memory_space<vmem>>, vector<1x8x8xf32>
    %22 = vector.shape_cast %21 : vector<1x8x8xf32> to vector<8x8xf32>
    %cst_14 = arith.constant dense<0.000000e+00> : vector<8x8xf32>
    %23 = tpu.matmul %16, %19, %cst_14 {dimension_numbers = #tpu.dot_dimension_numbers<[1], [1], [0], [0], [0, 0, 1, 0], [], []>} : vector<8x8xf32>, vector<8x8xf32>, vector<8x8xf32> -> vector<8x8xf32>
    %cst_15 = arith.constant dense<0xFF800000> : vector<8xf32>
    %24 = vector.multi_reduction <maximumf>, %23, %cst_15 [1] : vector<8x8xf32> to vector<8xf32>
    %25 = vector.shape_cast %24 : vector<8xf32> to vector<8x1xf32>
    %26 = vector.broadcast %25 : vector<8x1xf32> to vector<8x8xf32>
    %27 = arith.subf %23, %26 : vector<8x8xf32>
    %28 = math.exp %27 : vector<8x8xf32>
    %cst_16 = arith.constant dense<0.000000e+00> : vector<8xf32>
    %29 = vector.multi_reduction <add>, %28, %cst_16 [1] : vector<8x8xf32> to vector<8xf32>
    %30 = vector.shape_cast %29 : vector<8xf32> to vector<8x1xf32>
    %31 = tpu.reciprocal %30 {approx = true} : vector<8x1xf32> -> vector<8x1xf32>
    %32 = vector.broadcast %31 : vector<8x1xf32> to vector<8x8xf32>
    %33 = arith.mulf %28, %32 : vector<8x8xf32>
    %cst_17 = arith.constant dense<0.000000e+00> : vector<8x8xf32>
    %34 = tpu.matmul %33, %22, %cst_17 {dimension_numbers = #tpu.dot_dimension_numbers<[1], [0], [0], [1], [0, 0, 1, 1], [], []>} : vector<8x8xf32>, vector<8x8xf32>, vector<8x8xf32> -> vector<8x8xf32>
    %35 = arith.index_cast %c0_i32_5 : i32 to index
    %c0_18 = arith.constant 0 : index
    %c0_19 = arith.constant 0 : index
    %36 = vector.load %arg10[%35, %c0_18, %c0_19] : memref<4x8x32xf32, #tpu.memory_space<vmem>>, vector<1x8x32xf32>
    %37 = vector.shape_cast %36 : vector<1x8x32xf32> to vector<8x32xf32>
    %cst_20 = arith.constant dense<0.000000e+00> : vector<8x32xf32>
    %38 = tpu.matmul %34, %37, %cst_20 {dimension_numbers = #tpu.dot_dimension_numbers<[1], [0], [0], [1], [0, 0, 1, 1], [], []>} : vector<8x8xf32>, vector<8x32xf32>, vector<8x32xf32> -> vector<8x32xf32>
    %39 = arith.addf %7, %38 : vector<8x32xf32>
    %c1_i32 = arith.constant 1 : i32
    %40 = arith.index_cast %c1_i32 : i32 to index
    %c0_21 = arith.constant 0 : index
    %c0_22 = arith.constant 0 : index
    %41 = vector.load %arg4[%40, %c0_21, %c0_22] : memref<4x32x8xf32, #tpu.memory_space<vmem>>, vector<1x32x8xf32>
    %42 = vector.shape_cast %41 : vector<1x32x8xf32> to vector<32x8xf32>
    %cst_23 = arith.constant dense<0.000000e+00> : vector<8x8xf32>
    %43 = tpu.matmul %4, %42, %cst_23 {dimension_numbers = #tpu.dot_dimension_numbers<[1], [0], [0], [1], [0, 0, 1, 1], [], []>} : vector<8x32xf32>, vector<32x8xf32>, vector<8x8xf32> -> vector<8x8xf32>
    %44 = arith.index_cast %c1_i32 : i32 to index
    %c0_24 = arith.constant 0 : index
    %c0_25 = arith.constant 0 : index
    %45 = vector.load %arg7[%44, %c0_24, %c0_25] : memref<4x1x8xf32, #tpu.memory_space<vmem>>, vector<1x1x8xf32>
    %46 = vector.shape_cast %45 : vector<1x1x8xf32> to vector<1x8xf32>
    %47 = vector.broadcast %46 : vector<1x8xf32> to vector<8x8xf32>
    %48 = arith.addf %43, %47 : vector<8x8xf32>
    %49 = arith.index_cast %c1_i32 : i32 to index
    %c0_26 = arith.constant 0 : index
    %c0_27 = arith.constant 0 : index
    %50 = vector.load %arg21[%49, %c0_26, %c0_27] : memref<4x8x8xf32, #tpu.memory_space<vmem>>, vector<1x8x8xf32>
    %51 = vector.shape_cast %50 : vector<1x8x8xf32> to vector<8x8xf32>
    %52 = arith.index_cast %c1_i32 : i32 to index
    %c0_28 = arith.constant 0 : index
    %c0_29 = arith.constant 0 : index
    %53 = vector.load %arg22[%52, %c0_28, %c0_29] : memref<4x8x8xf32, #tpu.memory_space<vmem>>, vector<1x8x8xf32>
    %54 = vector.shape_cast %53 : vector<1x8x8xf32> to vector<8x8xf32>
    %cst_30 = arith.constant dense<0.000000e+00> : vector<8x8xf32>
    %55 = tpu.matmul %48, %51, %cst_30 {dimension_numbers = #tpu.dot_dimension_numbers<[1], [1], [0], [0], [0, 0, 1, 0], [], []>} : vector<8x8xf32>, vector<8x8xf32>, vector<8x8xf32> -> vector<8x8xf32>
    %cst_31 = arith.constant dense<0xFF800000> : vector<8xf32>
    %56 = vector.multi_reduction <maximumf>, %55, %cst_31 [1] : vector<8x8xf32> to vector<8xf32>
    %57 = vector.shape_cast %56 : vector<8xf32> to vector<8x1xf32>
    %58 = vector.broadcast %57 : vector<8x1xf32> to vector<8x8xf32>
    %59 = arith.subf %55, %58 : vector<8x8xf32>
    %60 = math.exp %59 : vector<8x8xf32>
    %cst_32 = arith.constant dense<0.000000e+00> : vector<8xf32>
    %61 = vector.multi_reduction <add>, %60, %cst_32 [1] : vector<8x8xf32> to vector<8xf32>
    %62 = vector.shape_cast %61 : vector<8xf32> to vector<8x1xf32>
    %63 = tpu.reciprocal %62 {approx = true} : vector<8x1xf32> -> vector<8x1xf32>
    %64 = vector.broadcast %63 : vector<8x1xf32> to vector<8x8xf32>
    %65 = arith.mulf %60, %64 : vector<8x8xf32>
    %cst_33 = arith.constant dense<0.000000e+00> : vector<8x8xf32>
    %66 = tpu.matmul %65, %54, %cst_33 {dimension_numbers = #tpu.dot_dimension_numbers<[1], [0], [0], [1], [0, 0, 1, 1], [], []>} : vector<8x8xf32>, vector<8x8xf32>, vector<8x8xf32> -> vector<8x8xf32>
    %67 = arith.index_cast %c1_i32 : i32 to index
    %c0_34 = arith.constant 0 : index
    %c0_35 = arith.constant 0 : index
    %68 = vector.load %arg10[%67, %c0_34, %c0_35] : memref<4x8x32xf32, #tpu.memory_space<vmem>>, vector<1x8x32xf32>
    %69 = vector.shape_cast %68 : vector<1x8x32xf32> to vector<8x32xf32>
    %cst_36 = arith.constant dense<0.000000e+00> : vector<8x32xf32>
    %70 = tpu.matmul %66, %69, %cst_36 {dimension_numbers = #tpu.dot_dimension_numbers<[1], [0], [0], [1], [0, 0, 1, 1], [], []>} : vector<8x8xf32>, vector<8x32xf32>, vector<8x32xf32> -> vector<8x32xf32>
    %71 = arith.addf %39, %70 : vector<8x32xf32>
    %c2_i32 = arith.constant 2 : i32
    %72 = arith.index_cast %c2_i32 : i32 to index
    %c0_37 = arith.constant 0 : index
    %c0_38 = arith.constant 0 : index
    %73 = vector.load %arg4[%72, %c0_37, %c0_38] : memref<4x32x8xf32, #tpu.memory_space<vmem>>, vector<1x32x8xf32>
    %74 = vector.shape_cast %73 : vector<1x32x8xf32> to vector<32x8xf32>
    %cst_39 = arith.constant dense<0.000000e+00> : vector<8x8xf32>
    %75 = tpu.matmul %4, %74, %cst_39 {dimension_numbers = #tpu.dot_dimension_numbers<[1], [0], [0], [1], [0, 0, 1, 1], [], []>} : vector<8x32xf32>, vector<32x8xf32>, vector<8x8xf32> -> vector<8x8xf32>
    %76 = arith.index_cast %c2_i32 : i32 to index
    %c0_40 = arith.constant 0 : index
    %c0_41 = arith.constant 0 : index
    %77 = vector.load %arg7[%76, %c0_40, %c0_41] : memref<4x1x8xf32, #tpu.memory_space<vmem>>, vector<1x1x8xf32>
    %78 = vector.shape_cast %77 : vector<1x1x8xf32> to vector<1x8xf32>
    %79 = vector.broadcast %78 : vector<1x8xf32> to vector<8x8xf32>
    %80 = arith.addf %75, %79 : vector<8x8xf32>
    %81 = arith.index_cast %c2_i32 : i32 to index
    %c0_42 = arith.constant 0 : index
    %c0_43 = arith.constant 0 : index
    %82 = vector.load %arg21[%81, %c0_42, %c0_43] : memref<4x8x8xf32, #tpu.memory_space<vmem>>, vector<1x8x8xf32>
    %83 = vector.shape_cast %82 : vector<1x8x8xf32> to vector<8x8xf32>
    %84 = arith.index_cast %c2_i32 : i32 to index
    %c0_44 = arith.constant 0 : index
    %c0_45 = arith.constant 0 : index
    %85 = vector.load %arg22[%84, %c0_44, %c0_45] : memref<4x8x8xf32, #tpu.memory_space<vmem>>, vector<1x8x8xf32>
    %86 = vector.shape_cast %85 : vector<1x8x8xf32> to vector<8x8xf32>
    %cst_46 = arith.constant dense<0.000000e+00> : vector<8x8xf32>
    %87 = tpu.matmul %80, %83, %cst_46 {dimension_numbers = #tpu.dot_dimension_numbers<[1], [1], [0], [0], [0, 0, 1, 0], [], []>} : vector<8x8xf32>, vector<8x8xf32>, vector<8x8xf32> -> vector<8x8xf32>
    %cst_47 = arith.constant dense<0xFF800000> : vector<8xf32>
    %88 = vector.multi_reduction <maximumf>, %87, %cst_47 [1] : vector<8x8xf32> to vector<8xf32>
    %89 = vector.shape_cast %88 : vector<8xf32> to vector<8x1xf32>
    %90 = vector.broadcast %89 : vector<8x1xf32> to vector<8x8xf32>
    %91 = arith.subf %87, %90 : vector<8x8xf32>
    %92 = math.exp %91 : vector<8x8xf32>
    %cst_48 = arith.constant dense<0.000000e+00> : vector<8xf32>
    %93 = vector.multi_reduction <add>, %92, %cst_48 [1] : vector<8x8xf32> to vector<8xf32>
    %94 = vector.shape_cast %93 : vector<8xf32> to vector<8x1xf32>
    %95 = tpu.reciprocal %94 {approx = true} : vector<8x1xf32> -> vector<8x1xf32>
    %96 = vector.broadcast %95 : vector<8x1xf32> to vector<8x8xf32>
    %97 = arith.mulf %92, %96 : vector<8x8xf32>
    %cst_49 = arith.constant dense<0.000000e+00> : vector<8x8xf32>
    %98 = tpu.matmul %97, %86, %cst_49 {dimension_numbers = #tpu.dot_dimension_numbers<[1], [0], [0], [1], [0, 0, 1, 1], [], []>} : vector<8x8xf32>, vector<8x8xf32>, vector<8x8xf32> -> vector<8x8xf32>
    %99 = arith.index_cast %c2_i32 : i32 to index
    %c0_50 = arith.constant 0 : index
    %c0_51 = arith.constant 0 : index
    %100 = vector.load %arg10[%99, %c0_50, %c0_51] : memref<4x8x32xf32, #tpu.memory_space<vmem>>, vector<1x8x32xf32>
    %101 = vector.shape_cast %100 : vector<1x8x32xf32> to vector<8x32xf32>
    %cst_52 = arith.constant dense<0.000000e+00> : vector<8x32xf32>
    %102 = tpu.matmul %98, %101, %cst_52 {dimension_numbers = #tpu.dot_dimension_numbers<[1], [0], [0], [1], [0, 0, 1, 1], [], []>} : vector<8x8xf32>, vector<8x32xf32>, vector<8x32xf32> -> vector<8x32xf32>
    %103 = arith.addf %71, %102 : vector<8x32xf32>
    %c3_i32 = arith.constant 3 : i32
    %104 = arith.index_cast %c3_i32 : i32 to index
    %c0_53 = arith.constant 0 : index
    %c0_54 = arith.constant 0 : index
    %105 = vector.load %arg4[%104, %c0_53, %c0_54] : memref<4x32x8xf32, #tpu.memory_space<vmem>>, vector<1x32x8xf32>
    %106 = vector.shape_cast %105 : vector<1x32x8xf32> to vector<32x8xf32>
    %cst_55 = arith.constant dense<0.000000e+00> : vector<8x8xf32>
    %107 = tpu.matmul %4, %106, %cst_55 {dimension_numbers = #tpu.dot_dimension_numbers<[1], [0], [0], [1], [0, 0, 1, 1], [], []>} : vector<8x32xf32>, vector<32x8xf32>, vector<8x8xf32> -> vector<8x8xf32>
    %108 = arith.index_cast %c3_i32 : i32 to index
    %c0_56 = arith.constant 0 : index
    %c0_57 = arith.constant 0 : index
    %109 = vector.load %arg7[%108, %c0_56, %c0_57] : memref<4x1x8xf32, #tpu.memory_space<vmem>>, vector<1x1x8xf32>
    %110 = vector.shape_cast %109 : vector<1x1x8xf32> to vector<1x8xf32>
    %111 = vector.broadcast %110 : vector<1x8xf32> to vector<8x8xf32>
    %112 = arith.addf %107, %111 : vector<8x8xf32>
    %113 = arith.index_cast %c3_i32 : i32 to index
    %c0_58 = arith.constant 0 : index
    %c0_59 = arith.constant 0 : index
    %114 = vector.load %arg21[%113, %c0_58, %c0_59] : memref<4x8x8xf32, #tpu.memory_space<vmem>>, vector<1x8x8xf32>
    %115 = vector.shape_cast %114 : vector<1x8x8xf32> to vector<8x8xf32>
    %116 = arith.index_cast %c3_i32 : i32 to index
    %c0_60 = arith.constant 0 : index
    %c0_61 = arith.constant 0 : index
    %117 = vector.load %arg22[%116, %c0_60, %c0_61] : memref<4x8x8xf32, #tpu.memory_space<vmem>>, vector<1x8x8xf32>
    %118 = vector.shape_cast %117 : vector<1x8x8xf32> to vector<8x8xf32>
    %cst_62 = arith.constant dense<0.000000e+00> : vector<8x8xf32>
    %119 = tpu.matmul %112, %115, %cst_62 {dimension_numbers = #tpu.dot_dimension_numbers<[1], [1], [0], [0], [0, 0, 1, 0], [], []>} : vector<8x8xf32>, vector<8x8xf32>, vector<8x8xf32> -> vector<8x8xf32>
    %cst_63 = arith.constant dense<0xFF800000> : vector<8xf32>
    %120 = vector.multi_reduction <maximumf>, %119, %cst_63 [1] : vector<8x8xf32> to vector<8xf32>
    %121 = vector.shape_cast %120 : vector<8xf32> to vector<8x1xf32>
    %122 = vector.broadcast %121 : vector<8x1xf32> to vector<8x8xf32>
    %123 = arith.subf %119, %122 : vector<8x8xf32>
    %124 = math.exp %123 : vector<8x8xf32>
    %cst_64 = arith.constant dense<0.000000e+00> : vector<8xf32>
    %125 = vector.multi_reduction <add>, %124, %cst_64 [1] : vector<8x8xf32> to vector<8xf32>
    %126 = vector.shape_cast %125 : vector<8xf32> to vector<8x1xf32>
    %127 = tpu.reciprocal %126 {approx = true} : vector<8x1xf32> -> vector<8x1xf32>
    %128 = vector.broadcast %127 : vector<8x1xf32> to vector<8x8xf32>
    %129 = arith.mulf %124, %128 : vector<8x8xf32>
    %cst_65 = arith.constant dense<0.000000e+00> : vector<8x8xf32>
    %130 = tpu.matmul %129, %118, %cst_65 {dimension_numbers = #tpu.dot_dimension_numbers<[1], [0], [0], [1], [0, 0, 1, 1], [], []>} : vector<8x8xf32>, vector<8x8xf32>, vector<8x8xf32> -> vector<8x8xf32>
    %131 = arith.index_cast %c3_i32 : i32 to index
    %c0_66 = arith.constant 0 : index
    %c0_67 = arith.constant 0 : index
    %132 = vector.load %arg10[%131, %c0_66, %c0_67] : memref<4x8x32xf32, #tpu.memory_space<vmem>>, vector<1x8x32xf32>
    %133 = vector.shape_cast %132 : vector<1x8x32xf32> to vector<8x32xf32>
    %cst_68 = arith.constant dense<0.000000e+00> : vector<8x32xf32>
    %134 = tpu.matmul %130, %133, %cst_68 {dimension_numbers = #tpu.dot_dimension_numbers<[1], [0], [0], [1], [0, 0, 1, 1], [], []>} : vector<8x8xf32>, vector<8x32xf32>, vector<8x32xf32> -> vector<8x32xf32>
    %135 = arith.addf %103, %134 : vector<8x32xf32>
    %c4_i32 = arith.constant 4 : i32
    %c0_69 = arith.constant 0 : index
    %c0_70 = arith.constant 0 : index
    %136 = vector.load %arg16[%c0_69, %c0_70] : memref<1x32xf32, #tpu.memory_space<vmem>>, vector<1x32xf32>
    %c0_71 = arith.constant 0 : index
    %c0_72 = arith.constant 0 : index
    %137 = vector.load %arg17[%c0_71, %c0_72] : memref<1x32xf32, #tpu.memory_space<vmem>>, vector<1x32xf32>
    %cst_73 = arith.constant dense<0.000000e+00> : vector<8xf32>
    %138 = vector.multi_reduction <add>, %135, %cst_73 [1] : vector<8x32xf32> to vector<8xf32>
    %139 = vector.shape_cast %138 : vector<8xf32> to vector<8x1xf32>
    %cst_74 = arith.constant 3.200000e+01 : f32
    %140 = vector.broadcast %cst_74 : f32 to vector<8x1xf32>
    %141 = arith.divf %139, %140 : vector<8x1xf32>
    %142 = vector.broadcast %141 : vector<8x1xf32> to vector<8x32xf32>
    %143 = arith.subf %135, %142 : vector<8x32xf32>
    %144 = arith.mulf %143, %143 : vector<8x32xf32>
    %cst_75 = arith.constant dense<0.000000e+00> : vector<8xf32>
    %145 = vector.multi_reduction <add>, %144, %cst_75 [1] : vector<8x32xf32> to vector<8xf32>
    %146 = vector.shape_cast %145 : vector<8xf32> to vector<8x1xf32>
    %cst_76 = arith.constant 3.200000e+01 : f32
    %147 = vector.broadcast %cst_76 : f32 to vector<8x1xf32>
    %148 = arith.divf %146, %147 : vector<8x1xf32>
    %cst_77 = arith.constant 9.99999974E-6 : f32
    %149 = vector.broadcast %cst_77 : f32 to vector<8x1xf32>
    %150 = arith.addf %148, %149 : vector<8x1xf32>
    %151 = math.rsqrt %150 : vector<8x1xf32>
    %152 = vector.broadcast %151 : vector<8x1xf32> to vector<8x32xf32>
    %153 = arith.mulf %143, %152 : vector<8x32xf32>
    %154 = vector.broadcast %136 : vector<1x32xf32> to vector<8x32xf32>
    %155 = arith.mulf %153, %154 : vector<8x32xf32>
    %156 = vector.broadcast %137 : vector<1x32xf32> to vector<8x32xf32>
    %157 = arith.addf %155, %156 : vector<8x32xf32>
    %c0_78 = arith.constant 0 : index
    %c0_79 = arith.constant 0 : index
    %158 = vector.load %arg15[%c0_78, %c0_79] : memref<1x32xf32, #tpu.memory_space<vmem>>, vector<1x32xf32>
    %159 = vector.broadcast %158 : vector<1x32xf32> to vector<8x32xf32>
    %160 = arith.addf %157, %159 : vector<8x32xf32>
    %c0_i32_80 = arith.constant 0 : i32
    %161 = arith.index_cast %c0_i32_80 : i32 to index
    %c0_81 = arith.constant 0 : index
    %c0_82 = arith.constant 0 : index
    %162 = vector.load %arg12[%161, %c0_81, %c0_82] : memref<1x32x64xf32, #tpu.memory_space<vmem>>, vector<1x32x64xf32>
    %163 = vector.shape_cast %162 : vector<1x32x64xf32> to vector<32x64xf32>
    %cst_83 = arith.constant dense<0.000000e+00> : vector<8x64xf32>
    %164 = tpu.matmul %157, %163, %cst_83 {dimension_numbers = #tpu.dot_dimension_numbers<[1], [0], [0], [1], [0, 0, 1, 1], [], []>} : vector<8x32xf32>, vector<32x64xf32>, vector<8x64xf32> -> vector<8x64xf32>
    %165 = arith.index_cast %c0_i32_80 : i32 to index
    %c0_84 = arith.constant 0 : index
    %c0_85 = arith.constant 0 : index
    %166 = vector.load %arg13[%165, %c0_84, %c0_85] : memref<1x1x64xf32, #tpu.memory_space<vmem>>, vector<1x1x64xf32>
    %167 = vector.shape_cast %166 : vector<1x1x64xf32> to vector<1x64xf32>
    %168 = vector.broadcast %167 : vector<1x64xf32> to vector<8x64xf32>
    %169 = arith.addf %164, %168 : vector<8x64xf32>
    %cst_86 = arith.constant 5.000000e-01 : f32
    %170 = vector.broadcast %cst_86 : f32 to vector<8x64xf32>
    %171 = arith.mulf %170, %169 : vector<8x64xf32>
    %cst_87 = arith.constant 2.000000e+00 : f32
    %172 = math.sqrt %cst_87 : f32
    %173 = vector.broadcast %172 : f32 to vector<8x64xf32>
    %174 = arith.divf %169, %173 : vector<8x64xf32>
    %175 = math.erf %174 : vector<8x64xf32>
    %cst_88 = arith.constant 1.000000e+00 : f32
    %176 = vector.broadcast %cst_88 : f32 to vector<8x64xf32>
    %177 = arith.addf %176, %175 : vector<8x64xf32>
    %178 = arith.mulf %171, %177 : vector<8x64xf32>
    %179 = arith.index_cast %c0_i32_80 : i32 to index
    %c0_89 = arith.constant 0 : index
    %c0_90 = arith.constant 0 : index
    %180 = vector.load %arg14[%179, %c0_89, %c0_90] : memref<1x64x32xf32, #tpu.memory_space<vmem>>, vector<1x64x32xf32>
    %181 = vector.shape_cast %180 : vector<1x64x32xf32> to vector<64x32xf32>
    %cst_91 = arith.constant dense<0.000000e+00> : vector<8x32xf32>
    %182 = tpu.matmul %178, %181, %cst_91 {dimension_numbers = #tpu.dot_dimension_numbers<[1], [0], [0], [1], [0, 0, 1, 1], [], []>} : vector<8x64xf32>, vector<64x32xf32>, vector<8x32xf32> -> vector<8x32xf32>
    %183 = arith.addf %160, %182 : vector<8x32xf32>
    %c1_i32_92 = arith.constant 1 : i32
    %c0_93 = arith.constant 0 : index
    %c0_94 = arith.constant 0 : index
    %184 = vector.load %arg18[%c0_93, %c0_94] : memref<1x32xf32, #tpu.memory_space<vmem>>, vector<1x32xf32>
    %c0_95 = arith.constant 0 : index
    %c0_96 = arith.constant 0 : index
    %185 = vector.load %arg19[%c0_95, %c0_96] : memref<1x32xf32, #tpu.memory_space<vmem>>, vector<1x32xf32>
    %cst_97 = arith.constant dense<0.000000e+00> : vector<8xf32>
    %186 = vector.multi_reduction <add>, %183, %cst_97 [1] : vector<8x32xf32> to vector<8xf32>
    %187 = vector.shape_cast %186 : vector<8xf32> to vector<8x1xf32>
    %cst_98 = arith.constant 3.200000e+01 : f32
    %188 = vector.broadcast %cst_98 : f32 to vector<8x1xf32>
    %189 = arith.divf %187, %188 : vector<8x1xf32>
    %190 = vector.broadcast %189 : vector<8x1xf32> to vector<8x32xf32>
    %191 = arith.subf %183, %190 : vector<8x32xf32>
    %192 = arith.mulf %191, %191 : vector<8x32xf32>
    %cst_99 = arith.constant dense<0.000000e+00> : vector<8xf32>
    %193 = vector.multi_reduction <add>, %192, %cst_99 [1] : vector<8x32xf32> to vector<8xf32>
    %194 = vector.shape_cast %193 : vector<8xf32> to vector<8x1xf32>
    %cst_100 = arith.constant 3.200000e+01 : f32
    %195 = vector.broadcast %cst_100 : f32 to vector<8x1xf32>
    %196 = arith.divf %194, %195 : vector<8x1xf32>
    %cst_101 = arith.constant 9.99999974E-6 : f32
    %197 = vector.broadcast %cst_101 : f32 to vector<8x1xf32>
    %198 = arith.addf %196, %197 : vector<8x1xf32>
    %199 = math.rsqrt %198 : vector<8x1xf32>
    %200 = vector.broadcast %199 : vector<8x1xf32> to vector<8x32xf32>
    %201 = arith.mulf %191, %200 : vector<8x32xf32>
    %202 = vector.broadcast %184 : vector<1x32xf32> to vector<8x32xf32>
    %203 = arith.mulf %201, %202 : vector<8x32xf32>
    %204 = vector.broadcast %185 : vector<1x32xf32> to vector<8x32xf32>
    %205 = arith.addf %203, %204 : vector<8x32xf32>
    %c0_102 = arith.constant 0 : index
    %c0_103 = arith.constant 0 : index
    %c0_104 = arith.constant 0 : index
    %206 = vector.load %arg20[%c0_102, %c0_103, %c0_104] : memref<1x8x32xf32, #tpu.memory_space<vmem>>, vector<1x8x32xf32>
    %207 = vector.shape_cast %206 : vector<1x8x32xf32> to vector<8x32xf32>
    %208 = vector.shape_cast %205 : vector<8x32xf32> to vector<1x8x32xf32>
    tpu.vector_store %arg20[%c0_102, %c0_103, %c0_104], %208 {strides = array<i32>} : memref<1x8x32xf32, #tpu.memory_space<vmem>>, vector<1x8x32xf32>,
    return
  }
  func.func @transform_0(%arg0: i32, %arg1: i32) -> (i32, i32, i32) {
    %c0_i32 = arith.constant 0 : i32
    %c0_i32_0 = arith.constant 0 : i32
    return %arg0, %arg1, %c0_i32 : i32, i32, i32
  }
  func.func @transform_1(%arg0: i32, %arg1: i32) -> (i32, i32, i32) {
    %c0_i32 = arith.constant 0 : i32
    %c0_i32_0 = arith.constant 0 : i32
    %c0_i32_1 = arith.constant 0 : i32
    return %arg0, %c0_i32, %c0_i32_0 : i32, i32, i32
  }
  func.func @transform_2(%arg0: i32, %arg1: i32) -> (i32, i32, i32) {
    %c0_i32 = arith.constant 0 : i32
    %c0_i32_0 = arith.constant 0 : i32
    %c0_i32_1 = arith.constant 0 : i32
    %c0_i32_2 = arith.constant 0 : i32
    return %c0_i32, %c0_i32_0, %c0_i32_1 : i32, i32, i32
  }
  func.func @transform_3(%arg0: i32, %arg1: i32) -> (i32, i32, i32) {
    %c0_i32 = arith.constant 0 : i32
    %c0_i32_0 = arith.constant 0 : i32
    %c0_i32_1 = arith.constant 0 : i32
    %c0_i32_2 = arith.constant 0 : i32
    return %c0_i32, %c0_i32_0, %c0_i32_1 : i32, i32, i32
  }
  func.func @transform_4(%arg0: i32, %arg1: i32) -> (i32, i32, i32) {
    %c0_i32 = arith.constant 0 : i32
    %c0_i32_0 = arith.constant 0 : i32
    %c0_i32_1 = arith.constant 0 : i32
    %c0_i32_2 = arith.constant 0 : i32
    return %c0_i32, %c0_i32_0, %c0_i32_1 : i32, i32, i32
  }
  func.func @transform_5(%arg0: i32, %arg1: i32) -> (i32, i32, i32) {
    %c0_i32 = arith.constant 0 : i32
    %c0_i32_0 = arith.constant 0 : i32
    %c0_i32_1 = arith.constant 0 : i32
    %c0_i32_2 = arith.constant 0 : i32
    return %c0_i32, %c0_i32_0, %c0_i32_1 : i32, i32, i32
  }
  func.func @transform_6(%arg0: i32, %arg1: i32) -> (i32, i32, i32) {
    %c0_i32 = arith.constant 0 : i32
    %c0_i32_0 = arith.constant 0 : i32
    %c0_i32_1 = arith.constant 0 : i32
    %c0_i32_2 = arith.constant 0 : i32
    return %c0_i32, %c0_i32_0, %c0_i32_1 : i32, i32, i32
  }
  func.func @transform_7(%arg0: i32, %arg1: i32) -> (i32, i32, i32) {
    %c0_i32 = arith.constant 0 : i32
    %c0_i32_0 = arith.constant 0 : i32
    %c0_i32_1 = arith.constant 0 : i32
    %c0_i32_2 = arith.constant 0 : i32
    return %c0_i32, %c0_i32_0, %c0_i32_1 : i32, i32, i32
  }
  func.func @transform_8(%arg0: i32, %arg1: i32) -> (i32, i32, i32) {
    %c0_i32 = arith.constant 0 : i32
    %c0_i32_0 = arith.constant 0 : i32
    %c0_i32_1 = arith.constant 0 : i32
    %c0_i32_2 = arith.constant 0 : i32
    return %c0_i32, %c0_i32_0, %c0_i32_1 : i32, i32, i32
  }
  func.func @transform_9(%arg0: i32, %arg1: i32) -> (i32, i32) {
    %c0_i32 = arith.constant 0 : i32
    %c0_i32_0 = arith.constant 0 : i32
    %c0_i32_1 = arith.constant 0 : i32
    return %c0_i32, %c0_i32_0 : i32, i32
  }
  func.func @transform_10(%arg0: i32, %arg1: i32) -> (i32, i32, i32) {
    %c0_i32 = arith.constant 0 : i32
    %c0_i32_0 = arith.constant 0 : i32
    %c0_i32_1 = arith.constant 0 : i32
    %c0_i32_2 = arith.constant 0 : i32
    return %c0_i32, %c0_i32_0, %c0_i32_1 : i32, i32, i32
  }
  func.func @transform_11(%arg0: i32, %arg1: i32) -> (i32, i32, i32) {
    %c0_i32 = arith.constant 0 : i32
    %c0_i32_0 = arith.constant 0 : i32
    %c0_i32_1 = arith.constant 0 : i32
    %c0_i32_2 = arith.constant 0 : i32
    return %c0_i32, %c0_i32_0, %c0_i32_1 : i32, i32, i32
  }
  func.func @transform_12(%arg0: i32, %arg1: i32) -> (i32, i32, i32) {
    %c0_i32 = arith.constant 0 : i32
    %c0_i32_0 = arith.constant 0 : i32
    %c0_i32_1 = arith.constant 0 : i32
    %c0_i32_2 = arith.constant 0 : i32
    return %c0_i32, %c0_i32_0, %c0_i32_1 : i32, i32, i32
  }
  func.func @transform_13(%arg0: i32, %arg1: i32) -> (i32, i32) {
    %c0_i32 = arith.constant 0 : i32
    %c0_i32_0 = arith.constant 0 : i32
    %c0_i32_1 = arith.constant 0 : i32
    return %c0_i32, %c0_i32_0 : i32, i32
  }
  func.func @transform_14(%arg0: i32, %arg1: i32) -> (i32, i32) {
    %c0_i32 = arith.constant 0 : i32
    %c0_i32_0 = arith.constant 0 : i32
    %c0_i32_1 = arith.constant 0 : i32
    return %c0_i32, %c0_i32_0 : i32, i32
  }
  func.func @transform_15(%arg0: i32, %arg1: i32) -> (i32, i32) {
    %c0_i32 = arith.constant 0 : i32
    %c0_i32_0 = arith.constant 0 : i32
    %c0_i32_1 = arith.constant 0 : i32
    return %c0_i32, %c0_i32_0 : i32, i32
  }
  func.func @transform_16(%arg0: i32, %arg1: i32) -> (i32, i32) {
    %c0_i32 = arith.constant 0 : i32
    %c0_i32_0 = arith.constant 0 : i32
    %c0_i32_1 = arith.constant 0 : i32
    return %c0_i32, %c0_i32_0 : i32, i32
  }
  func.func @transform_17(%arg0: i32, %arg1: i32) -> (i32, i32) {
    %c0_i32 = arith.constant 0 : i32
    %c0_i32_0 = arith.constant 0 : i32
    %c0_i32_1 = arith.constant 0 : i32
    return %c0_i32, %c0_i32_0 : i32, i32
  }
  func.func @transform_18(%arg0: i32, %arg1: i32) -> (i32, i32, i32) {
    %c0_i32 = arith.constant 0 : i32
    %c0_i32_0 = arith.constant 0 : i32
    return %arg0, %arg1, %c0_i32 : i32, i32, i32
  }
}

</mosaic_0001>

<bundles_post_ra>
// kernel: tpu_custom_call.1
= control target key start
LH: loop header
LB: loop body
LE: loop exit
PB: predicated region body
PF: predicated region fallthrough
CT: control target
= control target key end

     0   :  { %s4254_s0 = inlined_call_operand.vmem [shape: f32[2,8,32], index: 0, kind: input, shape index: {}]   ;;  %s4255_s1 = inlined_call_operand.vmem [shape: f32[2,8,32], index: 1, kind: input, shape index: {}]   ;;  %s4256_s2 = inlined_call_operand.vmem [shape: f32[4,32,8], index: 2, kind: input, shape index: {}]   ;;  %s4257_s3 = inlined_call_operand.vmem [shape: f32[4,32,8], index: 3, kind: input, shape index: {}]   ;;  %s4258_s4 = inlined_call_operand.vmem [shape: f32[4,32,8], index: 4, kind: input, shape index: {}]   ;;  %s4259_s5 = inlined_call_operand.vmem [shape: f32[4,1,8], index: 5, kind: input, shape index: {}]   ;;  %s4260_s6 = inlined_call_operand.vmem [shape: f32[4,1,8], index: 6, kind: input, shape index: {}]   ;;  %s4261_s7 = inlined_call_operand.vmem [shape: f32[4,1,8], index: 7, kind: input, shape index: {}]   ;;  %s4262_s8 = inlined_call_operand.vmem [shape: f32[4,8,32], index: 8, kind: input, shape index: {}]   ;;  %s4263_s9 = inlined_call_operand.vmem [shape: f32[1,32], index: 9, kind: input, shape index: {}]   ;;  %s4264_s10 = inlined_call_operand.vmem [shape: f32[1,32,64], index: 10, kind: input, shape index: {}]   ;;  %s4265_s11 = inlined_call_operand.vmem [shape: f32[1,1,64], index: 11, kind: input, shape index: {}]   ;;  %s4266_s12 = inlined_call_operand.vmem [shape: f32[1,64,32], index: 12, kind: input, shape index: {}]   ;;  %s4267_s13 = inlined_call_operand.vmem [shape: f32[1,32], index: 13, kind: input, shape index: {}]   ;;  %s4268_s14 = inlined_call_operand.vmem [shape: f32[1,32], index: 14, kind: input, shape index: {}]   ;;  %s4269_s15 = inlined_call_operand.vmem [shape: f32[1,32], index: 15, kind: input, shape index: {}]   ;;  %s4270_s16 = inlined_call_operand.vmem [shape: f32[1,32], index: 16, kind: input, shape index: {}]   ;;  %s4271_s17 = inlined_call_operand.vmem [shape: f32[1,32], index: 17, kind: input, shape index: {}]   ;;  %s4272_s18 = inlined_call_operand.hbm [shape: f32[2,8,32], index: 18, kind: output, shape index: {}]  }
   0x1   :  { %4280 = sst [smem:[#allocation13_spill]] %s4254_s0 }
   0x2   :  { %4281 = sst [smem:[#allocation14_spill]] %s4255_s1 }
   0x3   :  { %4282 = sst [smem:[#allocation15_spill]] %s4256_s2 }
   0x4   :  { %4283 = sst [smem:[#allocation16_spill]] %s4257_s3 }
   0x5   :  { %4284 = sst [smem:[#allocation17_spill]] %s4258_s4 }
   0x6   :  { %4285 = sst [smem:[#allocation18_spill]] %s4272_s18 }
   0x7   :  { %23 = vsyncpa [#allocation5], 0 }
   0x8   :  { %25 = vsyncpa [#allocation5 + $0x1], 0  ;;  %s3722_s27 = smov 0   ;;  %s3724_s28 = smov 0  }
   0x9   :  { %s3726_s29 = smov 0   ;;  %s3728_s30 = smov 0  }
   0xa   :  { %s3730_s0 = smov 0   ;;  %s3732_s19 = smov 0  }
   0xb LB: > { %4286 = sst [smem:[#allocation7_spill]] %s3601_s27  ;;  %s2937_s1 = sadd.s32 4294967295, %s3621_s19   ;;  %s3621_s19 = sphi %s3732_s19, %s31_s19   ;;  %s3617_s0 = sphi %s3730_s0, %s4305_s0   ;;  %s3613_s30 = sphi %s3728_s30, %s4304_s30   ;;  %s3609_s29 = sphi %s3726_s29, %s4303_s29   ;;  %s3605_s28 = sphi %s3724_s28, %s4307_s28   ;;  %s3601_s27 = sphi %s3722_s27, %s4306_s27  }
   0xc   : > { %4287 = sst [smem:[#allocation8_spill]] %s3609_s29  ;;  %s2938_s20 = sadd.s32 4294967294, %s3621_s19  }
   0xd   : > { %4288 = sst [smem:[#allocation9_spill]] %s3617_s0  ;;  %s43_s21 = sadd.s32 1, %s3617_s0 }
   0xe   : > { %s442_s22 = sadd.s32 1, %s3609_s29  ;;  %p45_p0 = scmp.ge.s32.totalorder %s43_s21, 2 }
   0xf   : > { %p452_p1 = scmp.ne.s32.totalorder %s3609_s29, %s3605_s28  ;;  %p453_p2 = scmp.eq.s32.totalorder %s2937_s1, 1 }
  0x10   : > { %p458_p3 = scmp.ne.s32.totalorder %s3605_s28, %s3601_s27  ;;  %s4309_s21 = smov (%p45_p0, %s43_s21), 0 }
  0x11   : > { %4289 = sst [smem:[#allocation10_spill]] %s4309_s21  ;;  %p3762_p4 = por %p453_p2, %p452_p1 }
  0x12   : > { %p459_p5 = scmp.eq.s32.totalorder %s2938_s20, 1  ;;  %s437_s23 = ssub.s32 %s3617_s0, %s4309_s21 }
  0x13   : > { %p2941_p6 = scmp.ge.s32.totalorder %s3621_s19, 1  ;;  %p440_p7 = scmp.eq.s32.totalorder %s437_s23, 0 }
  0x14   : > { %p3769_p8 = por %p459_p5, %p458_p3  ;;  %p542_p9 = scmp.lt.s32.totalorder %s3621_s19, 3 }
  0x15   : > { %s3775_s25 = scalar_select %p440_p7, %s3609_s29, %s442_s22  }
  0x16   : > { %s4291_s24 = scalar_select %p3769_p8, 1, 0 }
  0x17   : > { %4293 = sst [smem:[#allocation12_spill]] %s3775_s25  ;;  %p543_p10 = pnand %p2941_p6, %p542_p9 }
  0x18   : > { %4292 = sst [smem:[#allocation11_spill]] %s4291_s24  ;;  %v3623_v3 = vmov (!%p543_p10), 0.0|0.0   ;;  %vm3624_vm0 = vmmov (!%p543_p10), 0   ;;  %v3625_v6 = vmov (!%p543_p10), 0.0   ;;  %p602_p11 = scmp.lt.s32.totalorder (!%p543_p10), %s3613_s30, 1  ;;  %vm629_vm1 = vcmask (!%p543_p10), 261120  }
  0x19   : > { %546 = sbr.rel (%p543_p10) target bundleno = 4554 (0x11ca), region = 92  ;;  %s4294_s3 = sld [smem:[#allocation16_spill]] (!%p543_p10)  ;;  %3378 = vmatprep.subr.bf16.mxu0 (!%p543_p10), %v3623_v3  ;;  %3174 = vmatprep.mubr.msk.f32.mxu0 (!%p543_p10), %vm3624_vm0, %v3625_v6  ;;  %v2954_v58 = vld [vmem:[%s4260_s6 + $0x1] ss:$0 sm:$0xff] (!%p543_p10)  ;;  %vm703_vm2 = vcmask (!%p543_p10), 64512   ;;  %vm2734_vm3 = vcmask (!%p543_p10), 523264  }
  0x1a   : > { %3366 = vmatprep.subr.bf16.mxu1 (!%p543_p10), %v3623_v3  ;;  %3152 = vmatprep.mubr.msk.f32.mxu1 (!%p543_p10), %vm3624_vm0, %v3625_v6  ;;  %s4295_s29 = sld [smem:[#allocation14_spill]] (!%p543_p10)  ;;  %s4296_s4 = sld [smem:[#allocation17_spill]] (!%p543_p10)  ;;  %v2945_v60 = vld [vmem:[%s4260_s6] ss:$0 sm:$0xff] (!%p543_p10) }
  0x1b   : > { %s4297_s22 = sld [smem:[#allocation15_spill]] (!%p543_p10)  ;;  %s4298_s23 = sld [smem:[#allocation13_spill]] (!%p543_p10) }
  0x1c   : > { %s599_s20 = sand.u32 (!%p543_p10), 1, %s3605_s28  }
  0x1f   : > { %v2949_v0 = vld [vmem:[%s4294_s3 + $0x20] sm:$0xff] (!%p543_p10)  ;;  %v2950_v1 = vld [vmem:[%s4294_s3 + $0x28] sm:$0xff] (!%p543_p10)  ;;  %v2951_v2 = vld [vmem:[%s4294_s3 + $0x30] sm:$0xff] (!%p543_p10) }
  0x20   : > { %v3379_v4 = vpack.c.bf16 %v2950_v1, %v2949_v0  ;;  %v2952_v5 = vld [vmem:[%s4294_s3 + $0x38] sm:$0xff]  ;;  %v618_v7 = vld [vmem:[%s4294_s3] sm:$0xff]  ;;  %v619_v8 = vld [vmem:[%s4294_s3 + $0x8] sm:$0xff]  ;;  %s3803_s21 = scalar_select %p602_p11, %s3613_s30, 1 }
  0x21   : > { %v3382_v9 = vpack.c.bf16 %v2952_v5, %v2951_v2  ;;  %v3367_v10 = vpack.c.bf16 %v619_v8, %v618_v7  ;;  %v620_v11 = vld [vmem:[%s4294_s3 + $0x10] sm:$0xff]  ;;  %v621_v12 = vld [vmem:[%s4294_s3 + $0x18] sm:$0xff]  ;;  %v2963_v13 = vld [vmem:[%s4294_s3 + $0x40] sm:$0xff] }
  0x22   : > { %3380 = vmatpush3.bf16.msra.mxu0 %v3379_v4  ;;  %v2964_v14 = vld [vmem:[%s4294_s3 + $0x48] sm:$0xff]  ;;  %s2943_s25 = sshll.u32 %s3803_s21, 3  ;;  %v3370_v15 = vpack.c.bf16 %v621_v12, %v620_v11  ;;  %v705_v16 = vld [vmem:[%s4296_s4] sm:$0xff]  ;;  %v2965_v20 = vld [vmem:[%s4294_s3 + $0x50] sm:$0xff] }
  0x23   : > { %3381 = vmatprep.subr.bf16.mxu0 %v3623_v3  ;;  %3368 = vmatpush3.bf16.msra.mxu1 %v3367_v10  ;;  %s612_s24 = scalar_lea.vmem %s4295_s29, %s2943_s25  ;;  %v3391_v18 = vpack.c.bf16 %v2964_v14, %v2963_v13  ;;  %v706_v19 = vld [vmem:[%s4296_s4 + $0x8] sm:$0xff]  ;;  %v2966_v21 = vld [vmem:[%s4294_s3 + $0x58] sm:$0xff]  ;;  %v707_v23 = vld [vmem:[%s4296_s4 + $0x10] sm:$0xff]  ;;  %s608_s18 = scalar_lea.vmem %s4298_s23, %s2943_s25 }
  0x24   : > { %3369 = vmatprep.subr.bf16.mxu1 %v3623_v3  ;;  %v3828_v17 = vld [vmem:[%s612_s24] sm:$0xff]  ;;  %v3373_v22 = vpack.c.bf16 %v706_v19, %v705_v16  ;;  %v708_v24 = vld [vmem:[%s4296_s4 + $0x18] sm:$0xff]  ;;  %v3394_v25 = vpack.c.bf16 %v2966_v21, %v2965_v20  ;;  %v2978_v27 = vld [vmem:[%s4294_s3 + $0x68] sm:$0xff]  ;;  %s2942_s24 = sshll.u32 %s599_s20, 3  ;;  %s3043_s25 = sshll.u32 %s3613_s30, 7 }
  0x25   : > { %v2977_v26 = vld [vmem:[%s4294_s3 + $0x60] sm:$0xff]  ;;  %v3376_v28 = vpack.c.bf16 %v708_v24, %v707_v23  ;;  %v2957_v30 = vld [vmem:[%s4296_s4 + $0x28] sm:$0xff]  ;;  %v2979_v32 = vld [vmem:[%s4294_s3 + $0x70] sm:$0xff]  ;;  %s601_s27 = scalar_lea.vmem [#allocation4], %s2942_s24  ;;  %s2840_s23 = scalar_lea.sflag [#allocation5], %s599_s20 }
  0x26   : > { %3383 = vmatpush3.bf16.msra.mxu0 %v3382_v9  ;;  %v2956_v29 = vld [vmem:[%s4296_s4 + $0x20] sm:$0xff]  ;;  %v3403_v31 = vpack.c.bf16 %v2978_v27, %v2977_v26  ;;  %v2980_v33 = vld [vmem:[%s4294_s3 + $0x78] sm:$0xff]  ;;  %v2958_v35 = vld [vmem:[%s4296_s4 + $0x30] sm:$0xff]  ;;  %s2854_s26 = sshll.u32 %s601_s27, 4  ;;  %s4299_s3 = sld [smem:[#allocation18_spill]]  ;;  %s4208_s26 = int_to_ptr.vmem [resolvable:$true] %s2854_s26 }
  0x27   : > { %3390 = vmatprep.subr.bf16.mxu0 %v3623_v3  ;;  %3371 = vmatpush3.bf16.msra.mxu1 %v3370_v15  ;;  %v3385_v34 = vpack.c.bf16 %v2957_v30, %v2956_v29  ;;  %v2959_v36 = vld [vmem:[%s4296_s4 + $0x38] sm:$0xff]  ;;  %v3406_v37 = vpack.c.bf16 %v2980_v33, %v2979_v32  ;;  %v1306_v38 = vld [vmem:[%s4297_s22] sm:$0xff]  ;;  %v1307_v39 = vld [vmem:[%s4297_s22 + $0x8] sm:$0xff]  ;;  %s3626_s30 = smov [#allocation4]  }
  0x28   : > { %3372 = vmatprep.subr.bf16.mxu1 %v3623_v3  ;;  %v3388_v40 = vpack.c.bf16 %v2959_v36, %v2958_v35  ;;  %v3415_v41 = vpack.c.bf16 %v1307_v39, %v1306_v38  ;;  %v1308_v42 = vld [vmem:[%s4297_s22 + $0x10] sm:$0xff]  ;;  %v1309_v43 = vld [vmem:[%s4297_s22 + $0x18] sm:$0xff]  ;;  %v3921_v45 = vld [vmem:[%s608_s18] sm:$0xff]  ;;  %s3543_s18 = scalar_lea.vmem %s4208_s26, 128  ;;  %s3547_s24 = sshll.u32 %s3626_s30, 4  ;;  %s3548_s24 = int_to_ptr.vmem [resolvable:$false] %s3547_s24 }
  0x29   : > { %3175 = vmatmul.mubr.msk.f32.vlgmr.msra.gmra.mrb[0].mxu0 %vm629_vm1, %v3828_v17  ;;  %v3418_v44 = vpack.c.bf16 %v1309_v43, %v1308_v42  ;;  %v2970_v46 = vld [vmem:[%s4296_s4 + $0x40] sm:$0xff]  ;;  %v2971_v47 = vld [vmem:[%s4296_s4 + $0x48] sm:$0xff]  ;;  %v2972_v49 = vld [vmem:[%s4296_s4 + $0x50] sm:$0xff]  ;;  %p3544_p12 = scmp.ne.s32.totalorder %s4208_s26, %s3543_s18  ;;  %s3549_s21 = scalar_lea.vmem %s3548_s24, 256 }
  0x2a   : > { %3392 = vmatpush3.bf16.msra.mxu0 %v3391_v18  ;;  %3196 = vmatprep.mubr.msk.f32.mxu0 %vm3624_vm0, %v3625_v6  ;;  %v3397_v48 = vpack.c.bf16 %v2971_v47, %v2970_v46  ;;  %v2973_v50 = vld [vmem:[%s4296_s4 + $0x58] sm:$0xff]  ;;  %v2984_v52 = vld [vmem:[%s4296_s4 + $0x60] sm:$0xff]  ;;  %v2985_v53 = vld [vmem:[%s4296_s4 + $0x68] sm:$0xff]  ;;  %p3550_p1 = scmp.lt.s32.totalorder %s4208_s26, %s3548_s24  ;;  %p3551_p2 = scmp.lt.s32.totalorder %s3549_s21, %s3543_s18 }
  0x2b   : > { %3393 = vmatprep.subr.bf16.mxu0 %v3623_v3  ;;  %3153 = vmatmul.mubr.msk.f32.vlgmr.msra.gmra.mrb[0].mxu1 %vm629_vm1, %v3828_v17  ;;  %v3400_v51 = vpack.c.bf16 %v2973_v50, %v2972_v49  ;;  %v3409_v54 = vpack.c.bf16 %v2985_v53, %v2984_v52  ;;  %v2986_v55 = vld [vmem:[%s4296_s4 + $0x70] sm:$0xff]  ;;  %v2987_v56 = vld [vmem:[%s4296_s4 + $0x78] sm:$0xff]  ;;  %v2968_v2 = vld [vmem:[%s4260_s6 + $0x2] ss:$0 sm:$0xff]  ;;  %p3545_p13 = pnand %p3544_p12, %p3762_p4 }
  0x2c   : > { %3374 = vmatpush3.bf16.msra.mxu1 %v3373_v22  ;;  %3163 = vmatprep.mubr.msk.f32.mxu1 %vm3624_vm0, %v3625_v6  ;;  %v3412_v57 = vpack.c.bf16 %v2987_v56, %v2986_v55  ;;  %v2947_v5 = vld [vmem:[%s4261_s7] ss:$0 sm:$0xff]  ;;  %v2982_v13 = vld [vmem:[%s4260_s6 + $0x3] ss:$0 sm:$0xff]  ;;  %v2961_v15 = vld [vmem:[%s4261_s7 + $0x1] ss:$0 sm:$0xff]  ;;  %s4206_s4 = scalar_lea.hbm %s4299_s3, %s3043_s25  ;;  %p3552_p3 = por %p3551_p2, %p3550_p1 }
  0x2d   : > { %3375 = vmatprep.subr.bf16.mxu1 %v3623_v3  ;;  %v2992_v21 = vld [vmem:[%s4259_s5] ss:$0 sm:$0xff]  ;;  %v2975_v26 = vld [vmem:[%s4261_s7 + $0x2] ss:$0 sm:$0xff]  ;;  %v2989_v30 = vld [vmem:[%s4261_s7 + $0x3] ss:$0 sm:$0xff]  ;;  %p3546_p0 = pneg %p3545_p13 }
  0x2e   : > { %3395 = vmatpush3.bf16.msra.mxu0 %v3394_v25  ;;  %v1554_v42 = vld [vmem:[%s4262_s8] sm:$0xff]  ;;  %v2999_v46 = vld [vmem:[%s4297_s22 + $0x28] sm:$0xff]  ;;  %v3000_v50 = vld [vmem:[%s4297_s22 + $0x30] sm:$0xff] }
  0x2f   : > { %3402 = vmatprep.subr.bf16.mxu0 %v3623_v3  ;;  %v3010_v53 = vld [vmem:[%s4297_s22 + $0x40] sm:$0xff]  ;;  %v3012_v56 = vld [vmem:[%s4297_s22 + $0x50] sm:$0xff]  ;;  %p3553_p5 = pnand %p3552_p3, %p3546_p0 }
  0x30   : > { %3377 = vmatpush3.bf16.msra.mxu1 %v3376_v28 }
  0x31   : > { %3197 = vmatmul.mubr.msk.f32.vlgmr.msra.gmra.mrb[2].mxu0 %vm629_vm1, %v3828_v17  ;;  %3384 = vmatprep.subr.bf16.mxu1 %v3623_v3 }
  0x32   : > { %3404 = vmatpush3.bf16.msra.mxu0 %v3403_v31  ;;  %3218 = vmatprep.mubr.msk.f32.mxu0 %vm3624_vm0, %v3625_v6 }
  0x33   : > { %3405 = vmatprep.subr.bf16.mxu0 %v3623_v3  ;;  %3164 = vmatmul.mubr.msk.f32.vlgmr.msra.gmra.mrb[2].mxu1 %vm629_vm1, %v3828_v17 }
  0x34   : > { %3386 = vmatpush3.bf16.msra.mxu1 %v3385_v34  ;;  %3185 = vmatprep.mubr.msk.f32.mxu1 %vm3624_vm0, %v3625_v6 }
  0x35   : > { %3387 = vmatprep.subr.bf16.mxu1 %v3623_v3 }
  0x36   : > { %3407 = vmatpush3.bf16.msra.mxu0 %v3406_v37 }
  0x37   : > { %3414 = vmatprep.subr.bf16.mxu0 %v3623_v3 }
  0x38   : > { %3389 = vmatpush3.bf16.msra.mxu1 %v3388_v40 }
  0x39   : > { %3219 = vmatmul.mubr.msk.f32.vlgmr.msra.gmra.mrb[4].mxu0 %vm629_vm1, %v3828_v17  ;;  %3396 = vmatprep.subr.bf16.mxu1 %v3623_v3 }
  0x3a   : > { %3416 = vmatpush3.bf16.msra.mxu0 %v3415_v41  ;;  %3240 = vmatprep.mubr.msk.f32.mxu0 %vm3624_vm0, %v3625_v6 }
  0x3b   : > { %3417 = vmatprep.subr.bf16.mxu0 %v3623_v3  ;;  %3186 = vmatmul.mubr.msk.f32.vlgmr.msra.gmra.mrb[4].mxu1 %vm629_vm1, %v3828_v17 }
  0x3c   : > { %3207 = vmatprep.mubr.msk.f32.mxu1 %vm3624_vm0, %v3625_v6  ;;  %3398 = vmatpush3.bf16.msra.mxu1 %v3397_v48 }
  0x3d   : > { %3399 = vmatprep.subr.bf16.mxu1 %v3623_v3 }
  0x3e   : > { %3419 = vmatpush3.bf16.msra.mxu0 %v3418_v44  ;;  %v2998_v44 = vld [vmem:[%s4297_s22 + $0x20] sm:$0xff] }
  0x3f   : > { %3253 = vmatprep.subr.mxu0 %v3625_v6  ;;  %v3421_v48 = vpack.c.bf16 %v2999_v46, %v2998_v44 }
  0x40   : > { %3401 = vmatpush3.bf16.msra.mxu1 %v3400_v51  ;;  %v3001_v51 = vld [vmem:[%s4297_s22 + $0x38] sm:$0xff] }
  0x41   : > { %3241 = vmatmul.mubr.msk.f32.vlgmr.msra.gmra.mrb[6].mxu0 %vm629_vm1, %v3921_v45  ;;  %3408 = vmatprep.subr.bf16.mxu1 %v3623_v3  ;;  %v3424_v52 = vpack.c.bf16 %v3001_v51, %v3000_v50 }
  0x42   : > { %3255 = vmatprep.mubr.msk.f32.mxu0 %vm3624_vm0, %v3625_v6  ;;  %3254 = vmatpush3.msra.mxu0 %v1554_v42 }
  0x43   : > { %3208 = vmatmul.mubr.msk.f32.vlgmr.msra.gmra.mrb[6].mxu1 %vm629_vm1, %v3828_v17  ;;  %3269 = vmatprep.subr.mxu0 %v3625_v6 }
  0x44   : > { %3410 = vmatpush3.bf16.msra.mxu1 %v3409_v54  ;;  %3229 = vmatprep.mubr.msk.f32.mxu1 %vm3624_vm0, %v3625_v6  ;;  %v3011_v54 = vld [vmem:[%s4297_s22 + $0x48] sm:$0xff] }
  0x45   : > { %3411 = vmatprep.subr.bf16.mxu1 %v3623_v3  ;;  %v3427_v55 = vpack.c.bf16 %v3011_v54, %v3010_v53 }
  0x48   : > { %3413 = vmatpush3.bf16.msra.mxu1 %v3412_v57  ;;  %v3013_v57 = vld [vmem:[%s4297_s22 + $0x58] sm:$0xff] }
  0x49   : > { %3243 = vmatprep.subr.mxu1 %v3625_v6 }
  0x4b   : > { %3230 = vmatmul.mubr.msk.f32.vlgmr.msra.gmra.mrb[8].mxu1 %vm629_vm1, %v3828_v17 }
  0x4c   : > { %3245 = vmatprep.mubr.msk.f32.mxu1 %vm3624_vm0, %v3625_v6 }
  0xfc   : > { %v866_v59 = vpop.f32.mrb[0].mxu0 }
  0xfd   : > { %v867_v61 = vadd.f32 %v2954_v58, %v866_v59  ;;  %v3176_v62 = vpop.f32.mrb[1].mxu0  ;;  %v3430_v58 = vpack.c.bf16 %v3013_v57, %v3012_v56 }
  0xfe   : > { %v699_v63 = vpop.f32.mrb[0].mxu1 }
  0xff   : > { %871 = vst.msk [vmem:[#allocation2 + $0x8] sm:$0xff] %vm703_vm2, %v867_v61  ;;  %v700_v0 = vadd.f32 %v2945_v60, %v699_v63  ;;  %v3154_v1 = vpop.f32.mrb[1].mxu1  ;;  %v3003_v63 = vld [vmem:[%s4259_s5 + $0x1] ss:$0 sm:$0xff] }
 0x101   : > { %704 = vst.msk [vmem:[#allocation2] sm:$0xff] %vm703_vm2, %v700_v0 }
 0x104   : > { %v1036_v4 = vpop.f32.mrb[2].mxu0 }
 0x105   : > { %v1037_v7 = vadd.f32 %v2968_v2, %v1036_v4  ;;  %v3198_v8 = vpop.f32.mrb[3].mxu0 }
 0x106   : > { %v782_v9 = vpop.f32.mrb[2].mxu1  ;;  %v1713_v62 = vld [vmem:[#allocation2 + $0x8] sm:$0xff] }
 0x107   : > { %1041 = vst.msk [vmem:[#allocation2 + $0x10] sm:$0xff] %vm703_vm2, %v1037_v7  ;;  %v783_v10 = vadd.f32 %v2947_v5, %v782_v9  ;;  %v3165_v11 = vpop.f32.mrb[3].mxu1 }
 0x108   : > { %v1391_v12 = vld [vmem:[#allocation2] sm:$0xff] }
 0x109   : > { %3244 = vmatpush3.xpose.msk.msra.mxu1 %vm703_vm2, %v1391_v12  ;;  %786 = vst.msk [vmem:[#allocation3] sm:$0xff] %vm703_vm2, %v783_v10 }
 0x10a   : > { %3248 = vmatprep.subr.mxu1 %v3625_v6 }
 0x10c   : > { %v1206_v14 = vpop.f32.mrb[4].mxu0 }
 0x10d   : > { %v1207_v16 = vadd.f32 %v2982_v13, %v1206_v14  ;;  %v3220_v17 = vpop.f32.mrb[5].mxu0 }
 0x10e   : > { %v951_v18 = vpop.f32.mrb[4].mxu1  ;;  %v3008_v17 = vld [vmem:[%s4262_s8 + $0x8] sm:$0xff] }
 0x10f   : > { %1211 = vst.msk [vmem:[#allocation2 + $0x18] sm:$0xff] %vm703_vm2, %v1207_v16  ;;  %v952_v19 = vadd.f32 %v2961_v15, %v951_v18  ;;  %v3187_v20 = vpop.f32.mrb[5].mxu1 }
 0x110   : > { %v1392_v25 = vld [vmem:[#allocation3] sm:$0xff] }
 0x111   : > { %956 = vst.msk [vmem:[#allocation3 + $0x8] sm:$0xff] %vm703_vm2, %v952_v19  ;;  %v3015_v20 = vld [vmem:[%s4259_s5 + $0x2] ss:$0 sm:$0xff] }
 0x114   : > { %v1387_v22 = vpop.f32.mrb[6].mxu0 }
 0x115   : > { %v1388_v23 = vadd.f32 %v2992_v21, %v1387_v22  ;;  %v3242_v24 = vpop.f32.mrb[7].mxu0 }
 0x116   : > { %v1121_v27 = vpop.f32.mrb[6].mxu1  ;;  %v2036_v24 = vld [vmem:[#allocation2 + $0x10] sm:$0xff]  ;;  %v2359_v46 = vld [vmem:[#allocation2 + $0x18] sm:$0xff] }
 0x117   : > { %3246 = vmatmul.mubr.msk.f32.vlgmr.msra.gmra.mrb[10].mxu1 %vm703_vm2, %v1388_v23  ;;  %v1122_v28 = vadd.f32 %v2975_v26, %v1121_v27  ;;  %v3209_v29 = vpop.f32.mrb[7].mxu1 }
 0x118   : > { %3249 = vmatpush3.msra.mxu1 %v1392_v25  ;;  %3250 = vmatprep.mubr.msk.f32.mxu1 %vm3624_vm0, %v3625_v6  ;;  %v1715_v4 = vld [vmem:[#allocation3 + $0x8] sm:$0xff] }
 0x119   : > { %3420 = vmatprep.subr.bf16.mxu1 %v3623_v3  ;;  %1126 = vst.msk [vmem:[#allocation3 + $0x10] sm:$0xff] %vm703_vm2, %v1122_v28 }
 0x11e   : > { %v1291_v31 = vpop.f32.mrb[8].mxu1 }
 0x11f   : > { %v1292_v32 = vadd.f32 %v2989_v30, %v1291_v31  ;;  %v3231_v33 = vpop.f32.mrb[9].mxu1 }
 0x120   : > { %v2038_v59 = vld [vmem:[#allocation3 + $0x10] sm:$0xff] }
 0x121   : > { %1296 = vst.msk [vmem:[#allocation3 + $0x18] sm:$0xff] %vm703_vm2, %v1292_v32  ;;  %v3020_v33 = vld [vmem:[%s4262_s8 + $0x10] sm:$0xff] }
 0x128   : > { %v2361_v51 = vld [vmem:[#allocation3 + $0x18] sm:$0xff] }
 0x1ea   : > { %v1466_v34 = vpop.f32.mrb[10].mxu1 }
 0x1eb   : > { %v3247_v35 = vpop.f32.mrb[11].mxu1  ;;  %v1470_v36 = vsel %vm703_vm2, %v1466_v34, -inf }
 0x1ec   : > { %1471 = vmax.xlane.f32.xlu0 %v1470_v36  ;;  %v3022_v35 = vld [vmem:[%s4297_s22 + $0x60] sm:$0xff]  ;;  %v3023_v36 = vld [vmem:[%s4297_s22 + $0x68] sm:$0xff] }
 0x279   : > { %v1472_v37 = vpop.xlane.xlu0 %1471 }
 0x27a   : > { %v1473_v38 = vsub.f32 %v1466_v34, %v1472_v37 }
 0x27c   : > { %v1474_v39 = vmul.f32 1.442695, %v1473_v38  ;;  %v3433_v38 = vpack.c.bf16 %v3023_v36, %v3022_v35  ;;  %v2731_v35 = vld [vmem:[%s4266_s12 + $0x28] sm:$0xff] }
 0x27e   : > { %3521 = vpow2.f32 %v1474_v39 }
 0x288   : > { %v3522_v40 = vpop.eup %3521 }
 0x289   : > { %v1476_v41 = vsel %vm703_vm2, %v3522_v40, 0.0 }
 0x28a   : > { %1477 = vadd.xlane.f32.xlu0 %v1476_v41  ;;  %v3025_v41 = vld [vmem:[%s4297_s22 + $0x78] sm:$0xff] }
 0x317   : > { %v1478_v43 = vpop.xlane.xlu0 %1477 }
 0x318   : > { %3523 = vrcp.f32 %v1478_v43 }
 0x322   : > { %v3524_v47 = vpop.eup %3523 }
 0x323   : > { %v1480_v49 = vmul.f32 %v3524_v47, %v3522_v40  ;;  %v3024_v40 = vld [vmem:[%s4297_s22 + $0x70] sm:$0xff]  ;;  %v3027_v47 = vld [vmem:[%s4259_s5 + $0x3] ss:$0 sm:$0xff] }
 0x324   : > { %v3436_v42 = vpack.c.bf16 %v3025_v41, %v3024_v40  ;;  %v3037_v40 = vld [vmem:[%s4265_s11] ss:$0 sm:$0xff] }
 0x325   : > { %3251 = vmatmul.mubr.msk.f32.vlgmr.msra.gmra.mrb[12].mxu1 %vm703_vm2, %v1480_v49 }
 0x326   : > { %3422 = vmatpush3.bf16.msra.mxu1 %v3421_v48  ;;  %3266 = vmatprep.mubr.msk.f32.mxu1 %vm3624_vm0, %v3625_v6 }
 0x327   : > { %3423 = vmatprep.subr.bf16.mxu1 %v3623_v3 }
 0x32a   : > { %3425 = vmatpush3.bf16.msra.mxu1 %v3424_v52 }
 0x32b   : > { %3426 = vmatprep.subr.bf16.mxu1 %v3623_v3 }
 0x32d   : > { %3267 = vmatmul.mubr.msk.f32.vlgmr.msra.gmra.mrb[14].mxu1 %vm629_vm1, %v3921_v45 }
 0x32e   : > { %3428 = vmatpush3.bf16.msra.mxu1 %v3427_v55  ;;  %3292 = vmatprep.mubr.msk.f32.mxu1 %vm3624_vm0, %v3625_v6 }
 0x32f   : > { %3429 = vmatprep.subr.bf16.mxu1 %v3623_v3 }
 0x332   : > { %3431 = vmatpush3.bf16.msra.mxu1 %v3430_v58 }
 0x333   : > { %3300 = vmatprep.subr.mxu1 %v3625_v6 }
 0x335   : > { %3293 = vmatmul.mubr.msk.f32.vlgmr.msra.gmra.mrb[16].mxu1 %vm629_vm1, %v3921_v45 }
 0x336   : > { %3301 = vmatpush3.msra.mxu1 %v2038_v59  ;;  %3302 = vmatprep.mubr.msk.f32.mxu1 %vm3624_vm0, %v3625_v6 }
 0x337   : > { %3432 = vmatprep.subr.bf16.mxu1 %v3623_v3 }
 0x3f8   : > { %v1550_v60 = vpop.f32.mrb[12].mxu1 }
 0x3f9   : > { %v3252_v61 = vpop.f32.mrb[13].mxu1  ;;  %3256 = vmatmul.mubr.msk.f32.vlgmr.msra.gmra.mrb[8].mxu0 %vm703_vm2, %v1550_v60 }
 0x3fa   : > { %3270 = vmatpush3.xpose.msk.msra.mxu0 %vm703_vm2, %v1713_v62  ;;  %3271 = vmatprep.mubr.msk.f32.mxu0 %vm3624_vm0, %v3625_v6 }
 0x3fb   : > { %3274 = vmatprep.subr.mxu0 %v3625_v6 }
 0x400   : > { %v1708_v0 = vpop.f32.mrb[14].mxu1 }
 0x401   : > { %v1709_v1 = vadd.f32 %v3003_v63, %v1708_v0  ;;  %v3268_v2 = vpop.f32.mrb[15].mxu1  ;;  %v3032_v63 = vld [vmem:[%s4262_s8 + $0x18] sm:$0xff] }
 0x402   : > { %v2991_v2 = vld [vmem:[%s4263_s9] ss:$0 sm:$0xff] }
 0x403   : > { %3272 = vmatmul.mubr.msk.f32.vlgmr.msra.gmra.mrb[10].mxu0 %vm703_vm2, %v1709_v1 }
 0x404   : > { %3275 = vmatpush3.msra.mxu0 %v1715_v4  ;;  %3276 = vmatprep.mubr.msk.f32.mxu0 %vm3624_vm0, %v3625_v6  ;;  %v1305_v4 = vadd.f32 %v2991_v2, %v3921_v45  ;;  %v3041_v2 = vld [vmem:[%s4271_s17] ss:$0 sm:$0xff] }
 0x405   : > { %3279 = vmatprep.subr.mxu0 %v3625_v6 }
 0x408   : > { %v2031_v18 = vpop.f32.mrb[16].mxu1 }
 0x409   : > { %v3294_v19 = vpop.f32.mrb[17].mxu1  ;;  %v2032_v23 = vadd.f32 %v3015_v20, %v2031_v18 }
 0x4d6   : > { %v1788_v5 = vpop.f32.mrb[10].mxu0 }
 0x4d7   : > { %v3273_v7 = vpop.f32.mrb[11].mxu0  ;;  %v1792_v8 = vsel %vm703_vm2, %v1788_v5, -inf }
 0x4d8   : > { %1793 = vmax.xlane.f32.xlu1 %v1792_v8 }
 0x565   : > { %v1794_v9 = vpop.xlane.xlu1 %1793 }
 0x566   : > { %v1795_v10 = vsub.f32 %v1788_v5, %v1794_v9 }
 0x568   : > { %v1796_v11 = vmul.f32 1.442695, %v1795_v10 }
 0x56a   : > { %3525 = vpow2.f32 %v1796_v11 }
 0x574   : > { %v3526_v12 = vpop.eup %3525 }
 0x575   : > { %v1798_v13 = vsel %vm703_vm2, %v3526_v12, 0.0 }
 0x576   : > { %1799 = vadd.xlane.f32.xlu1 %v1798_v13 }
 0x603   : > { %v1800_v14 = vpop.xlane.xlu1 %1799 }
 0x604   : > { %3527 = vrcp.f32 %v1800_v14 }
 0x60e   : > { %v3528_v15 = vpop.eup %3527 }
 0x60f   : > { %v1802_v16 = vmul.f32 %v3528_v15, %v3526_v12 }
 0x611   : > { %3277 = vmatmul.mubr.msk.f32.vlgmr.msra.gmra.mrb[12].mxu0 %vm703_vm2, %v1802_v16  ;;  %v2638_v16 = vld [vmem:[%s4264_s10 + $0x10] sm:$0xff] }
 0x612   : > { %3280 = vmatpush3.msra.mxu0 %v3008_v17  ;;  %3281 = vmatprep.mubr.msk.f32.mxu0 %vm3624_vm0, %v3625_v6  ;;  %v2639_v17 = vld [vmem:[%s4264_s10 + $0x18] sm:$0xff] }
 0x613   : > { %3295 = vmatprep.subr.mxu0 %v3625_v6  ;;  %v3442_v18 = vpack.c.bf16 %v2639_v17, %v2638_v16 }
 0x6e4   : > { %v1872_v21 = vpop.f32.mrb[12].mxu0 }
 0x6e5   : > { %v3278_v22 = vpop.f32.mrb[13].mxu0  ;;  %3282 = vmatmul.mubr.msk.f32.vlgmr.msra.gmra.mrb[8].mxu0 %vm703_vm2, %v1872_v21 }
 0x6e6   : > { %3296 = vmatpush3.xpose.msk.msra.mxu0 %vm703_vm2, %v2036_v24  ;;  %3297 = vmatprep.mubr.msk.f32.mxu0 %vm3624_vm0, %v3625_v6 }
 0x6e7   : > { %3305 = vmatprep.subr.mxu0 %v3625_v6 }
 0x6e9   : > { %3298 = vmatmul.mubr.msk.f32.vlgmr.msra.gmra.mrb[14].mxu0 %vm703_vm2, %v2032_v23  ;;  %v3034_v23 = vld [vmem:[%s4268_s14] ss:$0 sm:$0xff] }
 0x6ea   : > { %3307 = vmatprep.mubr.msk.f32.mxu0 %vm3624_vm0, %v3625_v6  ;;  %3306 = vmatpush3.msra.mxu0 %v3020_v33 }
 0x6eb   : > { %3321 = vmatprep.subr.mxu0 %v3625_v6 }
 0x7bc   : > { %v2111_v25 = vpop.f32.mrb[14].mxu0 }
 0x7bd   : > { %v3299_v26 = vpop.f32.mrb[15].mxu0  ;;  %v2115_v27 = vsel %vm703_vm2, %v2111_v25, -inf }
 0x7be   : > { %2116 = vmax.xlane.f32.xlu0 %v2115_v27 }
 0x84b   : > { %v2117_v28 = vpop.xlane.xlu0 %2116 }
 0x84c   : > { %v2118_v29 = vsub.f32 %v2111_v25, %v2117_v28  ;;  %v3035_v25 = vld [vmem:[%s4269_s15] ss:$0 sm:$0xff] }
 0x84d   : > { %v2726_v28 = vld [vmem:[%s4266_s12] sm:$0xff] }
 0x84e   : > { %v2119_v30 = vmul.f32 1.442695, %v2118_v29  ;;  %v2727_v29 = vld [vmem:[%s4266_s12 + $0x8] sm:$0xff] }
 0x850   : > { %3529 = vpow2.f32 %v2119_v30  ;;  %v3445_v30 = vpack.c.bf16 %v2727_v29, %v2726_v28 }
 0x85a   : > { %v3530_v31 = vpop.eup %3529 }
 0x85b   : > { %v2121_v32 = vsel %vm703_vm2, %v3530_v31, 0.0 }
 0x85c   : > { %2122 = vadd.xlane.f32.xlu1 %v2121_v32  ;;  %v2729_v32 = vld [vmem:[%s4266_s12 + $0x18] sm:$0xff] }
 0x8e9   : > { %v2123_v34 = vpop.xlane.xlu1 %2122 }
 0x8ea   : > { %3531 = vrcp.f32 %v2123_v34  ;;  %v2730_v34 = vld [vmem:[%s4266_s12 + $0x20] sm:$0xff] }
 0x8eb   : > { %v3451_v36 = vpack.c.bf16 %v2731_v35, %v2730_v34 }
 0x8f4   : > { %v3532_v37 = vpop.eup %3531 }
 0x8f5   : > { %v2125_v39 = vmul.f32 %v3532_v37, %v3530_v31  ;;  %v2728_v31 = vld [vmem:[%s4266_s12 + $0x10] sm:$0xff] }
 0x8f6   : > { %v3448_v33 = vpack.c.bf16 %v2729_v32, %v2728_v31  ;;  %v2732_v37 = vld [vmem:[%s4266_s12 + $0x30] sm:$0xff] }
 0x8f7   : > { %3303 = vmatmul.mubr.msk.f32.vlgmr.msra.gmra.mrb[18].mxu1 %vm703_vm2, %v2125_v39 }
 0x8f8   : > { %3434 = vmatpush3.bf16.msra.mxu1 %v3433_v38  ;;  %3318 = vmatprep.mubr.msk.f32.mxu1 %vm3624_vm0, %v3625_v6  ;;  %v2733_v38 = vld [vmem:[%s4266_s12 + $0x38] sm:$0xff] }
 0x8f9   : > { %3435 = vmatprep.subr.bf16.mxu1 %v3623_v3  ;;  %v3454_v39 = vpack.c.bf16 %v2733_v38, %v2732_v37 }
 0x8fc   : > { %3437 = vmatpush3.bf16.msra.mxu1 %v3436_v42 }
 0x8fd   : > { %3438 = vmatprep.subr.bf16.mxu1 %v3623_v3 }
 0x8ff   : > { %3319 = vmatmul.mubr.msk.f32.vlgmr.msra.gmra.mrb[20].mxu1 %vm629_vm1, %v3921_v45  ;;  %v2637_v45 = vld [vmem:[%s4264_s10 + $0x8] sm:$0xff] }
 0x900   : > { %3344 = vmatprep.mubr.msk.f32.mxu1 %vm3624_vm0, %v3625_v6 }
 0x9ca   : > { %v2195_v43 = vpop.f32.mrb[18].mxu1 }
 0x9cb   : > { %v3304_v44 = vpop.f32.mrb[19].mxu1  ;;  %3308 = vmatmul.mubr.msk.f32.vlgmr.msra.gmra.mrb[8].mxu0 %vm703_vm2, %v2195_v43 }
 0x9cc   : > { %3322 = vmatpush3.xpose.msk.msra.mxu0 %vm703_vm2, %v2359_v46  ;;  %3323 = vmatprep.mubr.msk.f32.mxu0 %vm3624_vm0, %v3625_v6 }
 0x9cd   : > { %3326 = vmatprep.subr.mxu0 %v3625_v6 }
 0x9d2   : > { %v2354_v48 = vpop.f32.mrb[20].mxu1 }
 0x9d3   : > { %v2355_v49 = vadd.f32 %v3027_v47, %v2354_v48  ;;  %v3320_v50 = vpop.f32.mrb[21].mxu1 }
 0x9d5   : > { %3324 = vmatmul.mubr.msk.f32.vlgmr.msra.gmra.mrb[16].mxu0 %vm703_vm2, %v2355_v49  ;;  %v3036_v49 = vld [vmem:[%s4267_s13] ss:$0 sm:$0xff] }
 0x9d6   : > { %3327 = vmatpush3.msra.mxu0 %v2361_v51  ;;  %3328 = vmatprep.mubr.msk.f32.mxu0 %vm3624_vm0, %v3625_v6 }
 0x9d7   : > { %3331 = vmatprep.subr.mxu0 %v3625_v6 }
 0xaa8   : > { %v2434_v52 = vpop.f32.mrb[16].mxu0 }
 0xaa9   : > { %v3325_v53 = vpop.f32.mrb[17].mxu0  ;;  %v2438_v54 = vsel %vm703_vm2, %v2434_v52, -inf }
 0xaaa   : > { %2439 = vmax.xlane.f32.xlu0 %v2438_v54 }
 0xb37   : > { %v2440_v55 = vpop.xlane.xlu0 %2439 }
 0xb38   : > { %v2441_v56 = vsub.f32 %v2434_v52, %v2440_v55 }
 0xb3a   : > { %v2442_v57 = vmul.f32 1.442695, %v2441_v56 }
 0xb3c   : > { %3533 = vpow2.f32 %v2442_v57 }
 0xb46   : > { %v3534_v58 = vpop.eup %3533 }
 0xb47   : > { %v2444_v59 = vsel %vm703_vm2, %v3534_v58, 0.0 }
 0xb48   : > { %2445 = vadd.xlane.f32.xlu1 %v2444_v59 }
 0xbd5   : > { %v2446_v60 = vpop.xlane.xlu1 %2445 }
 0xbd6   : > { %3535 = vrcp.f32 %v2446_v60 }
 0xbe0   : > { %v3536_v61 = vpop.eup %3535 }
 0xbe1   : > { %v2448_v62 = vmul.f32 %v3536_v61, %v3534_v58 }
 0xbe3   : > { %3329 = vmatmul.mubr.msk.f32.vlgmr.msra.gmra.mrb[18].mxu0 %vm703_vm2, %v2448_v62 }
 0xbe4   : > { %3332 = vmatpush3.msra.mxu0 %v3032_v63  ;;  %3333 = vmatprep.mubr.msk.f32.mxu0 %vm3624_vm0, %v3625_v6 }
 0xbe5   : > { %3444 = vmatprep.subr.bf16.mxu0 %v3623_v3 }
 0xcb6   : > { %v2518_v0 = vpop.f32.mrb[18].mxu0 }
 0xcb7   : > { %v3330_v1 = vpop.f32.mrb[19].mxu0  ;;  %3334 = vmatmul.mubr.msk.f32.vlgmr.msra.gmra.mrb[8].mxu0 %vm703_vm2, %v2518_v0  ;;  %v3040_v0 = vld [vmem:[%s4270_s16] ss:$0 sm:$0xff] }
 0xcb8   : > { %3363 = vmatprep.mubr.msk.f32.mxu0 %vm3624_vm0, %v3625_v6  ;;  %v2636_v6 = vld [vmem:[%s4264_s10] sm:$0xff]  ;;  %3446 = vmatpush3.bf16.msra.mxu0 %v3445_v30 }
 0xcb9   : > { %v3439_v15 = vpack.c.bf16 %v2637_v45, %v2636_v6  ;;  %3447 = vmatprep.subr.bf16.mxu0 %v3623_v3 }
 0xcbb   : > { %3440 = vmatpush3.bf16.msra.mxu1 %v3439_v15 }
 0xcbc   : > { %3441 = vmatprep.subr.bf16.mxu1 %v3623_v3  ;;  %3449 = vmatpush3.bf16.msra.mxu0 %v3448_v33 }
 0xcbd   : > { %3450 = vmatprep.subr.bf16.mxu0 %v3623_v3 }
 0xcbf   : > { %3443 = vmatpush3.bf16.msra.mxu1 %v3442_v18 }
 0xcc0   : > { %3452 = vmatpush3.bf16.msra.mxu0 %v3451_v36 }
 0xcc1   : > { %3453 = vmatprep.subr.bf16.mxu0 %v3623_v3 }
 0xcc4   : > { %3455 = vmatpush3.bf16.msra.mxu0 %v3454_v39 }
 0xd8a   : > { %v2593_v5 = vpop.f32.mrb[8].mxu0 }
 0xd8b   : > { %v3456_v7 = vadd.f32 %v2593_v5, %v1305_v4  ;;  %v3335_v8 = vpop.f32.mrb[9].mxu0 }
 0xd8d   : > { %v2600_v9 = vsel %vm629_vm1, %v3456_v7, 0.0 }
 0xd8e   : > { %2601 = vadd.xlane.f32.xlu0 %v2600_v9 }
 0xe1b   : > { %v2602_v10 = vpop.xlane.xlu0 %2601 }
 0xe1c   : > { %v2604_v11 = vmul.f32 0.03125, %v2602_v10 }
 0xe1e   : > { %v2605_v12 = vsub.f32 %v3456_v7, %v2604_v11 }
 0xe20   : > { %v2606_v13 = vmul.f32 %v2605_v12, %v2605_v12 }
 0xe22   : > { %v2607_v14 = vsel %vm629_vm1, %v2606_v13, 0.0 }
 0xe23   : > { %2608 = vadd.xlane.f32.xlu1 %v2607_v14 }
 0xeb0   : > { %v2609_v19 = vpop.xlane.xlu1 %2608 }
 0xeb1   : > { %v2610_v20 = vmul.f32 0.03125, %v2609_v19 }
 0xeb3   : > { %v2611_v21 = vadd.f32 1e-05, %v2610_v20 }
 0xeb5   : > { %3537 = vrsqrt.f32 %v2611_v21 }
 0xebf   : > { %v3538_v22 = vpop.eup %3537 }
 0xec0   : > { %v2613_v24 = vmul.f32 %v3538_v22, %v2605_v12 }
 0xec2   : > { %v2620_v26 = vmul.f32 %v3034_v23, %v2613_v24 }
 0xec4   : > { %v2627_v27 = vadd.f32 %v3035_v25, %v2620_v26 }
 0xec6   : > { %3345 = vmatmul.mubr.msk.f32.vlgmr.msra.gmra.mrb[22].mxu1 %vm629_vm1, %v2627_v27  ;;  %v2635_v50 = vadd.f32 %v3036_v49, %v2627_v27 }
 0xf99   : > { %v2716_v41 = vpop.f32.mrb[22].mxu1 }
 0xf9a   : > { %v2717_v42 = vadd.f32 %v3037_v40, %v2716_v41  ;;  %v3346_v43 = vpop.f32.mrb[23].mxu1 }
 0xf9c   : > { %v2722_v44 = vmul.f32 0.70710677, %v2717_v42  ;;  %v2720_v46 = vmul.f32 0.5, %v2717_v42 }
 0xf9e   : > { %3539 = verf.f32 %v2722_v44 }
 0xfa8   : > { %v3540_v3 = vpop.eup %3539 }
 0xfa9   : > { %v2724_v47 = vadd.f32 1.0, %v3540_v3 }
 0xfab   : > { %v2725_v48 = vmul.f32 %v2724_v47, %v2720_v46 }
 0xfad   : > { %3364 = vmatmul.mubr.msk.f32.vlgmr.msra.gmra.mrb[20].mxu0 %vm2734_vm3, %v2725_v48 }
0x1080   : > { %v2804_v51 = vpop.f32.mrb[20].mxu0 }
0x1081   : > { %v2808_v52 = vadd.f32 %v2804_v51, %v2635_v50  ;;  %v3365_v53 = vpop.f32.mrb[21].mxu0 }
0x1083   : > { %v2811_v54 = vsel %vm629_vm1, %v2808_v52, 0.0 }
0x1084   : > { %2812 = vadd.xlane.f32.xlu0 %v2811_v54 }
0x1111   : > { %v2813_v55 = vpop.xlane.xlu0 %2812 }
0x1112   : > { %v2814_v56 = vmul.f32 0.03125, %v2813_v55 }
0x1114   : > { %v2815_v57 = vsub.f32 %v2808_v52, %v2814_v56 }
0x1116   : > { %v2816_v58 = vmul.f32 %v2815_v57, %v2815_v57 }
0x1118   : > { %v2817_v59 = vsel %vm629_vm1, %v2816_v58, 0.0 }
0x1119   : > { %2818 = vadd.xlane.f32.xlu1 %v2817_v59 }
0x11a6   : > { %v2819_v60 = vpop.xlane.xlu1 %2818 }
0x11a7   : > { %v2820_v61 = vmul.f32 0.03125, %v2819_v60 }
0x11a9   : > { %v2821_v62 = vadd.f32 1e-05, %v2820_v61 }
0x11ab   : > { %3541 = vrsqrt.f32 %v2821_v62 }
0x11b5   : > { %v3542_v63 = vpop.eup %3541 }
0x11b6   : > { %v2823_v1 = vmul.f32 %v3542_v63, %v2815_v57 }
0x11b8   : > { %v2830_v4 = vmul.f32 %v3040_v0, %v2823_v1 }
0x11ba   : > { %v2837_v5 = vadd.f32 %v3041_v2, %v2830_v4 }
0x11bc   : > { %2838 = vst.msk [vmem:[%s601_s27] sm:$0xff] %vm629_vm1, %v2837_v5 }
0x11bd   : > { %3556 = shalt.err (!%p3553_p5)
}
0x11be   : > { %s3557_s20 = scalar_lea.hbm %s4206_s4, 128  ;;  %s3561_s27 = scalar_lea.hbm %s4299_s3, 256 }
0x11bf   : > { %p3558_p6 = scmp.ne.s32.totalorder %s4206_s4, %s3557_s20  ;;  %p3562_p10 = scmp.lt.u32.totalorder %s4206_s4, %s4299_s3 }
0x11c0   : > { %p3563_p11 = scmp.lt.u32.totalorder %s3561_s27, %s3557_s20  ;;  %p3565_p13 = scmp.lt.u32.totalorder %s3557_s20, %s4206_s4 }
0x11c1   : > { %p3559_p7 = pnand %p3558_p6, %p3762_p4 }
0x11c2   : > { %p3564_p12 = por %p3563_p11, %p3562_p10 }
0x11c3   : > { %p3560_p9 = pneg %p3559_p7 }
0x11c4   : > { %p3566_p0 = por %p3565_p13, %p3564_p12 }
0x11c6   : > { %p3567_p1 = pnand %p3566_p0, %p3560_p9 }
0x11c8   : > { %3570 = shalt.err (!%p3567_p1)
}
0x11c9   : > { %3463 = dma.vmem_to_hbm [thread:$0]  (%p3762_p4), %s4208_s26, 128, %s4206_s4, %s2840_s23  }
0x11ca PF: > { %s4300_s18 = sld [smem:[#allocation7_spill]]  ;;  %p3469_p2 = scmp.ge.s32.totalorder %s3621_s19, 2 }
0x11cc   : > { %p3466_p3 = pnand %p3469_p2, %p3769_p8 }
0x11d0   : > { %s2866_s24 = sand.u32 1, %s4300_s18  }
0x11d1   : > { %s2867_s21 = scalar_lea.sflag [#allocation5], %s2866_s24 }
0x11d2   : > { %3596 = dma.done.wait (!%p3466_p3), %s2867_s21, 128  }
0x11d3   : > { %3598 = vsyncadd (!%p3466_p3), %s2867_s21, 4294967168  ;;  %s31_s19 = sadd.s32 1, %s3621_s19   ;;  %s4302_s20 = sld [smem:[#allocation8_spill]] }
0x11d4   : > { %p28_p5 = scmp.ge.s32.totalorder %s31_s19, 4   ;;  %s4303_s29 = sld [smem:[#allocation12_spill]] }
0x11d5   : > { %s4304_s30 = sld [smem:[#allocation9_spill]]  ;;  %s4305_s0 = sld [smem:[#allocation10_spill]] }
0x11d6   : > { %s4306_s27 = smov %s3605_s28  ;;  %30 = sbr.rel (!%p28_p5) target bundleno = 11 (0xb), region = 167 }
0x11d9   : > { %s4307_s28 = smov %s4302_s20 }
0x11dd   :  { %2872 = vsyncpa [#allocation5], 1 }
0x11de   :  { %2874 = vsyncpa [#allocation5 + $0x1], 1 }

</bundles_post_ra>
